<compile_context>
chip_gen: v5e
topology: v5e:2x2
jax: 0.10.0
libtpu: 0.0.40
codegen_flags: <defaults>
</compile_context>

<pallas_src>
import math
import functools

import jax
import jax.numpy as jnp
from jax.experimental import pallas as pl
from jax.experimental.pallas import tpu as pltpu


def _level_params(h, w, level):
    """Static pooling parameters for one pyramid level (matches the torch code)."""
    kh = math.ceil(h / level)
    kw = math.ceil(w / level)
    sh, sw = kh, kw
    ph = math.floor((kh * level - h + 1) / 2)
    pw = math.floor((kw * level - w + 1) / 2)
    # PyTorch max_pool2d output size (ceil_mode=False)
    oh = (h + 2 * ph - kh) // sh + 1
    ow = (w + 2 * pw - kw) // sw + 1
    return kh, kw, sh, sw, ph, pw, oh, ow


def _spp_kernel(x_ref, *o_refs, params, H, W):
    # x_ref block: (1, H, W, C) channels-last; C on lanes, W on sublanes.
    # o_refs[l] block: (1, cells_l, C), cell index = oh * ow_n + ow.
    # TODO(synk): for much larger num_levels, switch the unrolled Python cell
    # loops to lax.fori_loop(..., unroll=True) to bound trace/code size.
    for o_ref, (kh, kw, sh, sw, ph, pw, oh_n, ow_n) in zip(o_refs, params):
        cells = []
        for oh in range(oh_n):
            h0 = max(oh * sh - ph, 0)
            h1 = min(oh * sh - ph + kh, H)
            # Phase 1: reduce the H window once per output row (reused by all
            # ow cells of this row).  Chain of element-wise maxima over (W, C)
            # slabs -> pure VPU, loads pulled row-by-row from VMEM.
            strip = x_ref[0, h0]                       # (W, C)
            for h in range(h0 + 1, h1):
                strip = jnp.maximum(strip, x_ref[0, h])
            # Phase 2: small per-cell reduction over the W window (sublane
            # axis); data volume here is ~ow_n*W*C, a fraction of phase 1.
            for ow in range(ow_n):
                w0 = max(ow * sw - pw, 0)
                w1 = min(ow * sw - pw + kw, W)
                cells.append(jnp.max(strip[w0:w1, :], axis=0, keepdims=True))
        # Single lane-dense store per level: (cells_l, C) with C on lanes.
        o_ref[0] = jnp.concatenate(cells, axis=0)


def spp_forward(x, num_levels):
    """Pallas SPP forward. x: (N, C, H, W) -> (N, C * sum_l oh_l*ow_l)."""
    N, C, H, W = x.shape
    if num_levels > min(H, W):
        # A level larger than the spatial size yields empty clipped windows
        # (PyTorch errors too, with padding > kernel/2).
        raise ValueError("num_levels must be <= min(H, W)")
    params = [_level_params(H, W, i + 1) for i in range(num_levels)]

    # Channels-last relayout so C is the lane axis inside the kernel.
    x_nhwc = jnp.transpose(x, (0, 2, 3, 1))            # (N, H, W, C)

    out_shapes = tuple(
        jax.ShapeDtypeStruct((N, p[6] * p[7], C), x.dtype) for p in params
    )
    out_specs = tuple(
        pl.BlockSpec((1, p[6] * p[7], C), lambda n: (n, 0, 0)) for p in params
    )

    # Double-buffered (1, H, W, C) input block + tiny per-level outputs.
    block_bytes = H * W * C * x.dtype.itemsize
    vmem_limit = int(min(max(32 * 1024 * 1024, 4 * block_bytes + (2 << 20)),
                         60 * 1024 * 1024))

    kernel = functools.partial(_spp_kernel, params=params, H=H, W=W)
    outs = pl.pallas_call(
        kernel,
        out_shape=out_shapes,
        grid=(N,),
        in_specs=[pl.BlockSpec((1, H, W, C), lambda n: (n, 0, 0, 0))],
        out_specs=out_specs,
        compiler_params=pltpu.CompilerParams(
            dimension_semantics=("parallel",),
            vmem_limit_bytes=vmem_limit,
        ),
    )(x_nhwc)
    if not isinstance(outs, (tuple, list)):
        outs = (outs,)

    # (N, cells, C) -> (N, C, cells) -> (N, C*cells) == torch .view(num, -1).
    # Output bytes are a few % of the input bytes, so this tiny rearrangement
    # is bandwidth-negligible; doing it in-kernel would require a
    # lane<->sublane relayout of the small (cells, C) tile.
    pieces = [jnp.transpose(o, (0, 2, 1)).reshape(N, -1) for o in outs]
    return jnp.concatenate(pieces, axis=1)


def spp_reference(x, num_levels):
    """Pure-JAX reference mirroring F.max_pool2d with -inf padding."""
    N, C, H, W = x.shape
    pieces = []
    for i in range(num_levels):
        kh, kw, sh, sw, ph, pw, oh_n, ow_n = _level_params(H, W, i + 1)
        cells = []
        for oh in range(oh_n):
            for ow in range(ow_n):
                h0 = max(oh * sh - ph, 0)
                w0 = max(ow * sw - pw, 0)
                h1 = min(oh * sh - ph + kh, H)
                w1 = min(ow * sw - pw + kw, W)
                cells.append(jnp.max(x[:, :, h0:h1, w0:w1], axis=(2, 3)))  # (N, C)
        lvl = jnp.stack(cells, axis=-1).reshape(N, C, oh_n * ow_n)
        pieces.append(lvl.reshape(N, -1))
    return jnp.concatenate(pieces, axis=1)


if __name__ == "__main__":
    num_levels = 4
    key = jax.random.PRNGKey(0)
    x = jax.random.normal(key, (2, 4, 16, 16), dtype=jnp.float32)  # NCHW

    out = jax.block_until_ready(spp_forward(x, num_levels))
    ref = jax.block_until_ready(spp_reference(x, num_levels))

    expected_feats = 4 * sum(_level_params(16, 16, l + 1)[6] *
                             _level_params(16, 16, l + 1)[7]
                             for l in range(num_levels))
    assert out.shape == (2, expected_feats), out.shape
    assert jnp.allclose(out, ref), "mismatch vs reference"
    print("KERNEL_OK")
</pallas_src>

<mosaic_0001>
module attributes {stable_mosaic.version = 11 : i64} {
  func.func @_spp_kernel(%arg0: i32, %arg1: memref<1x16x16x4xf32, #tpu.memory_space<vmem>>, %arg2: memref<1x1x4xf32, #tpu.memory_space<vmem>>, %arg3: memref<1x4x4xf32, #tpu.memory_space<vmem>>, %arg4: memref<1x9x4xf32, #tpu.memory_space<vmem>>, %arg5: memref<1x16x4xf32, #tpu.memory_space<vmem>>) attributes {dimension_semantics = [#tpu.dimension_semantics<parallel>], iteration_bounds = array<i64: 2>, scalar_prefetch = 0 : i64, scratch_operands = 0 : i64, tpu.core_type = #tpu.core_type<tc>, window_params = [{transform_indices = @transform_0, window_bounds = array<i64: 1, 16, 16, 4>}, {transform_indices = @transform_1, window_bounds = array<i64: 1, 1, 4>}, {transform_indices = @transform_2, window_bounds = array<i64: 1, 4, 4>}, {transform_indices = @transform_3, window_bounds = array<i64: 1, 9, 4>}, {transform_indices = @transform_4, window_bounds = array<i64: 1, 16, 4>}]} {
    %c0 = arith.constant 0 : index
    %c0_0 = arith.constant 0 : index
    %c0_1 = arith.constant 0 : index
    %c0_2 = arith.constant 0 : index
    %0 = vector.load %arg1[%c0, %c0_0, %c0_1, %c0_2] : memref<1x16x16x4xf32, #tpu.memory_space<vmem>>, vector<1x1x16x4xf32>
    %1 = vector.shape_cast %0 : vector<1x1x16x4xf32> to vector<16x4xf32>
    %c0_3 = arith.constant 0 : index
    %c1 = arith.constant 1 : index
    %c0_4 = arith.constant 0 : index
    %c0_5 = arith.constant 0 : index
    %2 = vector.load %arg1[%c0_3, %c1, %c0_4, %c0_5] : memref<1x16x16x4xf32, #tpu.memory_space<vmem>>, vector<1x1x16x4xf32>
    %3 = vector.shape_cast %2 : vector<1x1x16x4xf32> to vector<16x4xf32>
    %4 = arith.maximumf %1, %3 : vector<16x4xf32>
    %c0_6 = arith.constant 0 : index
    %c2 = arith.constant 2 : index
    %c0_7 = arith.constant 0 : index
    %c0_8 = arith.constant 0 : index
    %5 = vector.load %arg1[%c0_6, %c2, %c0_7, %c0_8] : memref<1x16x16x4xf32, #tpu.memory_space<vmem>>, vector<1x1x16x4xf32>
    %6 = vector.shape_cast %5 : vector<1x1x16x4xf32> to vector<16x4xf32>
    %7 = arith.maximumf %4, %6 : vector<16x4xf32>
    %c0_9 = arith.constant 0 : index
    %c3 = arith.constant 3 : index
    %c0_10 = arith.constant 0 : index
    %c0_11 = arith.constant 0 : index
    %8 = vector.load %arg1[%c0_9, %c3, %c0_10, %c0_11] : memref<1x16x16x4xf32, #tpu.memory_space<vmem>>, vector<1x1x16x4xf32>
    %9 = vector.shape_cast %8 : vector<1x1x16x4xf32> to vector<16x4xf32>
    %10 = arith.maximumf %7, %9 : vector<16x4xf32>
    %c0_12 = arith.constant 0 : index
    %c4 = arith.constant 4 : index
    %c0_13 = arith.constant 0 : index
    %c0_14 = arith.constant 0 : index
    %11 = vector.load %arg1[%c0_12, %c4, %c0_13, %c0_14] : memref<1x16x16x4xf32, #tpu.memory_space<vmem>>, vector<1x1x16x4xf32>
    %12 = vector.shape_cast %11 : vector<1x1x16x4xf32> to vector<16x4xf32>
    %13 = arith.maximumf %10, %12 : vector<16x4xf32>
    %c0_15 = arith.constant 0 : index
    %c5 = arith.constant 5 : index
    %c0_16 = arith.constant 0 : index
    %c0_17 = arith.constant 0 : index
    %14 = vector.load %arg1[%c0_15, %c5, %c0_16, %c0_17] : memref<1x16x16x4xf32, #tpu.memory_space<vmem>>, vector<1x1x16x4xf32>
    %15 = vector.shape_cast %14 : vector<1x1x16x4xf32> to vector<16x4xf32>
    %16 = arith.maximumf %13, %15 : vector<16x4xf32>
    %c0_18 = arith.constant 0 : index
    %c6 = arith.constant 6 : index
    %c0_19 = arith.constant 0 : index
    %c0_20 = arith.constant 0 : index
    %17 = vector.load %arg1[%c0_18, %c6, %c0_19, %c0_20] : memref<1x16x16x4xf32, #tpu.memory_space<vmem>>, vector<1x1x16x4xf32>
    %18 = vector.shape_cast %17 : vector<1x1x16x4xf32> to vector<16x4xf32>
    %19 = arith.maximumf %16, %18 : vector<16x4xf32>
    %c0_21 = arith.constant 0 : index
    %c7 = arith.constant 7 : index
    %c0_22 = arith.constant 0 : index
    %c0_23 = arith.constant 0 : index
    %20 = vector.load %arg1[%c0_21, %c7, %c0_22, %c0_23] : memref<1x16x16x4xf32, #tpu.memory_space<vmem>>, vector<1x1x16x4xf32>
    %21 = vector.shape_cast %20 : vector<1x1x16x4xf32> to vector<16x4xf32>
    %22 = arith.maximumf %19, %21 : vector<16x4xf32>
    %c0_24 = arith.constant 0 : index
    %c8 = arith.constant 8 : index
    %c0_25 = arith.constant 0 : index
    %c0_26 = arith.constant 0 : index
    %23 = vector.load %arg1[%c0_24, %c8, %c0_25, %c0_26] : memref<1x16x16x4xf32, #tpu.memory_space<vmem>>, vector<1x1x16x4xf32>
    %24 = vector.shape_cast %23 : vector<1x1x16x4xf32> to vector<16x4xf32>
    %25 = arith.maximumf %22, %24 : vector<16x4xf32>
    %c0_27 = arith.constant 0 : index
    %c9 = arith.constant 9 : index
    %c0_28 = arith.constant 0 : index
    %c0_29 = arith.constant 0 : index
    %26 = vector.load %arg1[%c0_27, %c9, %c0_28, %c0_29] : memref<1x16x16x4xf32, #tpu.memory_space<vmem>>, vector<1x1x16x4xf32>
    %27 = vector.shape_cast %26 : vector<1x1x16x4xf32> to vector<16x4xf32>
    %28 = arith.maximumf %25, %27 : vector<16x4xf32>
    %c0_30 = arith.constant 0 : index
    %c10 = arith.constant 10 : index
    %c0_31 = arith.constant 0 : index
    %c0_32 = arith.constant 0 : index
    %29 = vector.load %arg1[%c0_30, %c10, %c0_31, %c0_32] : memref<1x16x16x4xf32, #tpu.memory_space<vmem>>, vector<1x1x16x4xf32>
    %30 = vector.shape_cast %29 : vector<1x1x16x4xf32> to vector<16x4xf32>
    %31 = arith.maximumf %28, %30 : vector<16x4xf32>
    %c0_33 = arith.constant 0 : index
    %c11 = arith.constant 11 : index
    %c0_34 = arith.constant 0 : index
    %c0_35 = arith.constant 0 : index
    %32 = vector.load %arg1[%c0_33, %c11, %c0_34, %c0_35] : memref<1x16x16x4xf32, #tpu.memory_space<vmem>>, vector<1x1x16x4xf32>
    %33 = vector.shape_cast %32 : vector<1x1x16x4xf32> to vector<16x4xf32>
    %34 = arith.maximumf %31, %33 : vector<16x4xf32>
    %c0_36 = arith.constant 0 : index
    %c12 = arith.constant 12 : index
    %c0_37 = arith.constant 0 : index
    %c0_38 = arith.constant 0 : index
    %35 = vector.load %arg1[%c0_36, %c12, %c0_37, %c0_38] : memref<1x16x16x4xf32, #tpu.memory_space<vmem>>, vector<1x1x16x4xf32>
    %36 = vector.shape_cast %35 : vector<1x1x16x4xf32> to vector<16x4xf32>
    %37 = arith.maximumf %34, %36 : vector<16x4xf32>
    %c0_39 = arith.constant 0 : index
    %c13 = arith.constant 13 : index
    %c0_40 = arith.constant 0 : index
    %c0_41 = arith.constant 0 : index
    %38 = vector.load %arg1[%c0_39, %c13, %c0_40, %c0_41] : memref<1x16x16x4xf32, #tpu.memory_space<vmem>>, vector<1x1x16x4xf32>
    %39 = vector.shape_cast %38 : vector<1x1x16x4xf32> to vector<16x4xf32>
    %40 = arith.maximumf %37, %39 : vector<16x4xf32>
    %c0_42 = arith.constant 0 : index
    %c14 = arith.constant 14 : index
    %c0_43 = arith.constant 0 : index
    %c0_44 = arith.constant 0 : index
    %41 = vector.load %arg1[%c0_42, %c14, %c0_43, %c0_44] : memref<1x16x16x4xf32, #tpu.memory_space<vmem>>, vector<1x1x16x4xf32>
    %42 = vector.shape_cast %41 : vector<1x1x16x4xf32> to vector<16x4xf32>
    %43 = arith.maximumf %40, %42 : vector<16x4xf32>
    %c0_45 = arith.constant 0 : index
    %c15 = arith.constant 15 : index
    %c0_46 = arith.constant 0 : index
    %c0_47 = arith.constant 0 : index
    %44 = vector.load %arg1[%c0_45, %c15, %c0_46, %c0_47] : memref<1x16x16x4xf32, #tpu.memory_space<vmem>>, vector<1x1x16x4xf32>
    %45 = vector.shape_cast %44 : vector<1x1x16x4xf32> to vector<16x4xf32>
    %46 = arith.maximumf %43, %45 : vector<16x4xf32>
    %cst = arith.constant dense<0xFF800000> : vector<4xf32>
    %47 = vector.multi_reduction <maximumf>, %46, %cst [0] : vector<16x4xf32> to vector<4xf32>
    %48 = vector.shape_cast %47 : vector<4xf32> to vector<1x4xf32>
    %c0_48 = arith.constant 0 : index
    %c0_49 = arith.constant 0 : index
    %c0_50 = arith.constant 0 : index
    %49 = vector.load %arg2[%c0_48, %c0_49, %c0_50] : memref<1x1x4xf32, #tpu.memory_space<vmem>>, vector<1x1x4xf32>
    %50 = vector.shape_cast %49 : vector<1x1x4xf32> to vector<1x4xf32>
    %51 = vector.shape_cast %48 : vector<1x4xf32> to vector<1x1x4xf32>
    tpu.vector_store %arg2[%c0_48, %c0_49, %c0_50], %51 {strides = array<i32>} : memref<1x1x4xf32, #tpu.memory_space<vmem>>, vector<1x1x4xf32>,
    %c0_51 = arith.constant 0 : index
    %c0_52 = arith.constant 0 : index
    %c0_53 = arith.constant 0 : index
    %c0_54 = arith.constant 0 : index
    %52 = vector.load %arg1[%c0_51, %c0_52, %c0_53, %c0_54] : memref<1x16x16x4xf32, #tpu.memory_space<vmem>>, vector<1x1x16x4xf32>
    %53 = vector.shape_cast %52 : vector<1x1x16x4xf32> to vector<16x4xf32>
    %c0_55 = arith.constant 0 : index
    %c1_56 = arith.constant 1 : index
    %c0_57 = arith.constant 0 : index
    %c0_58 = arith.constant 0 : index
    %54 = vector.load %arg1[%c0_55, %c1_56, %c0_57, %c0_58] : memref<1x16x16x4xf32, #tpu.memory_space<vmem>>, vector<1x1x16x4xf32>
    %55 = vector.shape_cast %54 : vector<1x1x16x4xf32> to vector<16x4xf32>
    %56 = arith.maximumf %53, %55 : vector<16x4xf32>
    %c0_59 = arith.constant 0 : index
    %c2_60 = arith.constant 2 : index
    %c0_61 = arith.constant 0 : index
    %c0_62 = arith.constant 0 : index
    %57 = vector.load %arg1[%c0_59, %c2_60, %c0_61, %c0_62] : memref<1x16x16x4xf32, #tpu.memory_space<vmem>>, vector<1x1x16x4xf32>
    %58 = vector.shape_cast %57 : vector<1x1x16x4xf32> to vector<16x4xf32>
    %59 = arith.maximumf %56, %58 : vector<16x4xf32>
    %c0_63 = arith.constant 0 : index
    %c3_64 = arith.constant 3 : index
    %c0_65 = arith.constant 0 : index
    %c0_66 = arith.constant 0 : index
    %60 = vector.load %arg1[%c0_63, %c3_64, %c0_65, %c0_66] : memref<1x16x16x4xf32, #tpu.memory_space<vmem>>, vector<1x1x16x4xf32>
    %61 = vector.shape_cast %60 : vector<1x1x16x4xf32> to vector<16x4xf32>
    %62 = arith.maximumf %59, %61 : vector<16x4xf32>
    %c0_67 = arith.constant 0 : index
    %c4_68 = arith.constant 4 : index
    %c0_69 = arith.constant 0 : index
    %c0_70 = arith.constant 0 : index
    %63 = vector.load %arg1[%c0_67, %c4_68, %c0_69, %c0_70] : memref<1x16x16x4xf32, #tpu.memory_space<vmem>>, vector<1x1x16x4xf32>
    %64 = vector.shape_cast %63 : vector<1x1x16x4xf32> to vector<16x4xf32>
    %65 = arith.maximumf %62, %64 : vector<16x4xf32>
    %c0_71 = arith.constant 0 : index
    %c5_72 = arith.constant 5 : index
    %c0_73 = arith.constant 0 : index
    %c0_74 = arith.constant 0 : index
    %66 = vector.load %arg1[%c0_71, %c5_72, %c0_73, %c0_74] : memref<1x16x16x4xf32, #tpu.memory_space<vmem>>, vector<1x1x16x4xf32>
    %67 = vector.shape_cast %66 : vector<1x1x16x4xf32> to vector<16x4xf32>
    %68 = arith.maximumf %65, %67 : vector<16x4xf32>
    %c0_75 = arith.constant 0 : index
    %c6_76 = arith.constant 6 : index
    %c0_77 = arith.constant 0 : index
    %c0_78 = arith.constant 0 : index
    %69 = vector.load %arg1[%c0_75, %c6_76, %c0_77, %c0_78] : memref<1x16x16x4xf32, #tpu.memory_space<vmem>>, vector<1x1x16x4xf32>
    %70 = vector.shape_cast %69 : vector<1x1x16x4xf32> to vector<16x4xf32>
    %71 = arith.maximumf %68, %70 : vector<16x4xf32>
    %c0_79 = arith.constant 0 : index
    %c7_80 = arith.constant 7 : index
    %c0_81 = arith.constant 0 : index
    %c0_82 = arith.constant 0 : index
    %72 = vector.load %arg1[%c0_79, %c7_80, %c0_81, %c0_82] : memref<1x16x16x4xf32, #tpu.memory_space<vmem>>, vector<1x1x16x4xf32>
    %73 = vector.shape_cast %72 : vector<1x1x16x4xf32> to vector<16x4xf32>
    %74 = arith.maximumf %71, %73 : vector<16x4xf32>
    %75 = vector.extract_strided_slice %74 {offsets = [0, 0], sizes = [8, 4], strides = [1, 1]} : vector<16x4xf32> to vector<8x4xf32>
    %cst_83 = arith.constant dense<0xFF800000> : vector<4xf32>
    %76 = vector.multi_reduction <maximumf>, %75, %cst_83 [0] : vector<8x4xf32> to vector<4xf32>
    %77 = vector.shape_cast %76 : vector<4xf32> to vector<1x4xf32>
    %78 = vector.extract_strided_slice %74 {offsets = [8, 0], sizes = [8, 4], strides = [1, 1]} : vector<16x4xf32> to vector<8x4xf32>
    %cst_84 = arith.constant dense<0xFF800000> : vector<4xf32>
    %79 = vector.multi_reduction <maximumf>, %78, %cst_84 [0] : vector<8x4xf32> to vector<4xf32>
    %80 = vector.shape_cast %79 : vector<4xf32> to vector<1x4xf32>
    %c0_85 = arith.constant 0 : index
    %c8_86 = arith.constant 8 : index
    %c0_87 = arith.constant 0 : index
    %c0_88 = arith.constant 0 : index
    %81 = vector.load %arg1[%c0_85, %c8_86, %c0_87, %c0_88] : memref<1x16x16x4xf32, #tpu.memory_space<vmem>>, vector<1x1x16x4xf32>
    %82 = vector.shape_cast %81 : vector<1x1x16x4xf32> to vector<16x4xf32>
    %c0_89 = arith.constant 0 : index
    %c9_90 = arith.constant 9 : index
    %c0_91 = arith.constant 0 : index
    %c0_92 = arith.constant 0 : index
    %83 = vector.load %arg1[%c0_89, %c9_90, %c0_91, %c0_92] : memref<1x16x16x4xf32, #tpu.memory_space<vmem>>, vector<1x1x16x4xf32>
    %84 = vector.shape_cast %83 : vector<1x1x16x4xf32> to vector<16x4xf32>
    %85 = arith.maximumf %82, %84 : vector<16x4xf32>
    %c0_93 = arith.constant 0 : index
    %c10_94 = arith.constant 10 : index
    %c0_95 = arith.constant 0 : index
    %c0_96 = arith.constant 0 : index
    %86 = vector.load %arg1[%c0_93, %c10_94, %c0_95, %c0_96] : memref<1x16x16x4xf32, #tpu.memory_space<vmem>>, vector<1x1x16x4xf32>
    %87 = vector.shape_cast %86 : vector<1x1x16x4xf32> to vector<16x4xf32>
    %88 = arith.maximumf %85, %87 : vector<16x4xf32>
    %c0_97 = arith.constant 0 : index
    %c11_98 = arith.constant 11 : index
    %c0_99 = arith.constant 0 : index
    %c0_100 = arith.constant 0 : index
    %89 = vector.load %arg1[%c0_97, %c11_98, %c0_99, %c0_100] : memref<1x16x16x4xf32, #tpu.memory_space<vmem>>, vector<1x1x16x4xf32>
    %90 = vector.shape_cast %89 : vector<1x1x16x4xf32> to vector<16x4xf32>
    %91 = arith.maximumf %88, %90 : vector<16x4xf32>
    %c0_101 = arith.constant 0 : index
    %c12_102 = arith.constant 12 : index
    %c0_103 = arith.constant 0 : index
    %c0_104 = arith.constant 0 : index
    %92 = vector.load %arg1[%c0_101, %c12_102, %c0_103, %c0_104] : memref<1x16x16x4xf32, #tpu.memory_space<vmem>>, vector<1x1x16x4xf32>
    %93 = vector.shape_cast %92 : vector<1x1x16x4xf32> to vector<16x4xf32>
    %94 = arith.maximumf %91, %93 : vector<16x4xf32>
    %c0_105 = arith.constant 0 : index
    %c13_106 = arith.constant 13 : index
    %c0_107 = arith.constant 0 : index
    %c0_108 = arith.constant 0 : index
    %95 = vector.load %arg1[%c0_105, %c13_106, %c0_107, %c0_108] : memref<1x16x16x4xf32, #tpu.memory_space<vmem>>, vector<1x1x16x4xf32>
    %96 = vector.shape_cast %95 : vector<1x1x16x4xf32> to vector<16x4xf32>
    %97 = arith.maximumf %94, %96 : vector<16x4xf32>
    %c0_109 = arith.constant 0 : index
    %c14_110 = arith.constant 14 : index
    %c0_111 = arith.constant 0 : index
    %c0_112 = arith.constant 0 : index
    %98 = vector.load %arg1[%c0_109, %c14_110, %c0_111, %c0_112] : memref<1x16x16x4xf32, #tpu.memory_space<vmem>>, vector<1x1x16x4xf32>
    %99 = vector.shape_cast %98 : vector<1x1x16x4xf32> to vector<16x4xf32>
    %100 = arith.maximumf %97, %99 : vector<16x4xf32>
    %c0_113 = arith.constant 0 : index
    %c15_114 = arith.constant 15 : index
    %c0_115 = arith.constant 0 : index
    %c0_116 = arith.constant 0 : index
    %101 = vector.load %arg1[%c0_113, %c15_114, %c0_115, %c0_116] : memref<1x16x16x4xf32, #tpu.memory_space<vmem>>, vector<1x1x16x4xf32>
    %102 = vector.shape_cast %101 : vector<1x1x16x4xf32> to vector<16x4xf32>
    %103 = arith.maximumf %100, %102 : vector<16x4xf32>
    %104 = vector.extract_strided_slice %103 {offsets = [0, 0], sizes = [8, 4], strides = [1, 1]} : vector<16x4xf32> to vector<8x4xf32>
    %cst_117 = arith.constant dense<0xFF800000> : vector<4xf32>
    %105 = vector.multi_reduction <maximumf>, %104, %cst_117 [0] : vector<8x4xf32> to vector<4xf32>
    %106 = vector.shape_cast %105 : vector<4xf32> to vector<1x4xf32>
    %107 = vector.extract_strided_slice %103 {offsets = [8, 0], sizes = [8, 4], strides = [1, 1]} : vector<16x4xf32> to vector<8x4xf32>
    %cst_118 = arith.constant dense<0xFF800000> : vector<4xf32>
    %108 = vector.multi_reduction <maximumf>, %107, %cst_118 [0] : vector<8x4xf32> to vector<4xf32>
    %109 = vector.shape_cast %108 : vector<4xf32> to vector<1x4xf32>
    %110 = tpu.concatenate %77, %80, %106, %109 in 0 : vector<1x4xf32>, vector<1x4xf32>, vector<1x4xf32>, vector<1x4xf32> -> vector<4x4xf32>
    %c0_119 = arith.constant 0 : index
    %c0_120 = arith.constant 0 : index
    %c0_121 = arith.constant 0 : index
    %111 = vector.load %arg3[%c0_119, %c0_120, %c0_121] : memref<1x4x4xf32, #tpu.memory_space<vmem>>, vector<1x4x4xf32>
    %112 = vector.shape_cast %111 : vector<1x4x4xf32> to vector<4x4xf32>
    %113 = vector.shape_cast %110 : vector<4x4xf32> to vector<1x4x4xf32>
    tpu.vector_store %arg3[%c0_119, %c0_120, %c0_121], %113 {strides = array<i32>} : memref<1x4x4xf32, #tpu.memory_space<vmem>>, vector<1x4x4xf32>,
    %c0_122 = arith.constant 0 : index
    %c0_123 = arith.constant 0 : index
    %c0_124 = arith.constant 0 : index
    %c0_125 = arith.constant 0 : index
    %114 = vector.load %arg1[%c0_122, %c0_123, %c0_124, %c0_125] : memref<1x16x16x4xf32, #tpu.memory_space<vmem>>, vector<1x1x16x4xf32>
    %115 = vector.shape_cast %114 : vector<1x1x16x4xf32> to vector<16x4xf32>
    %c0_126 = arith.constant 0 : index
    %c1_127 = arith.constant 1 : index
    %c0_128 = arith.constant 0 : index
    %c0_129 = arith.constant 0 : index
    %116 = vector.load %arg1[%c0_126, %c1_127, %c0_128, %c0_129] : memref<1x16x16x4xf32, #tpu.memory_space<vmem>>, vector<1x1x16x4xf32>
    %117 = vector.shape_cast %116 : vector<1x1x16x4xf32> to vector<16x4xf32>
    %118 = arith.maximumf %115, %117 : vector<16x4xf32>
    %c0_130 = arith.constant 0 : index
    %c2_131 = arith.constant 2 : index
    %c0_132 = arith.constant 0 : index
    %c0_133 = arith.constant 0 : index
    %119 = vector.load %arg1[%c0_130, %c2_131, %c0_132, %c0_133] : memref<1x16x16x4xf32, #tpu.memory_space<vmem>>, vector<1x1x16x4xf32>
    %120 = vector.shape_cast %119 : vector<1x1x16x4xf32> to vector<16x4xf32>
    %121 = arith.maximumf %118, %120 : vector<16x4xf32>
    %c0_134 = arith.constant 0 : index
    %c3_135 = arith.constant 3 : index
    %c0_136 = arith.constant 0 : index
    %c0_137 = arith.constant 0 : index
    %122 = vector.load %arg1[%c0_134, %c3_135, %c0_136, %c0_137] : memref<1x16x16x4xf32, #tpu.memory_space<vmem>>, vector<1x1x16x4xf32>
    %123 = vector.shape_cast %122 : vector<1x1x16x4xf32> to vector<16x4xf32>
    %124 = arith.maximumf %121, %123 : vector<16x4xf32>
    %c0_138 = arith.constant 0 : index
    %c4_139 = arith.constant 4 : index
    %c0_140 = arith.constant 0 : index
    %c0_141 = arith.constant 0 : index
    %125 = vector.load %arg1[%c0_138, %c4_139, %c0_140, %c0_141] : memref<1x16x16x4xf32, #tpu.memory_space<vmem>>, vector<1x1x16x4xf32>
    %126 = vector.shape_cast %125 : vector<1x1x16x4xf32> to vector<16x4xf32>
    %127 = arith.maximumf %124, %126 : vector<16x4xf32>
    %128 = vector.extract_strided_slice %127 {offsets = [0, 0], sizes = [5, 4], strides = [1, 1]} : vector<16x4xf32> to vector<5x4xf32>
    %cst_142 = arith.constant dense<0xFF800000> : vector<4xf32>
    %129 = vector.multi_reduction <maximumf>, %128, %cst_142 [0] : vector<5x4xf32> to vector<4xf32>
    %130 = vector.shape_cast %129 : vector<4xf32> to vector<1x4xf32>
    %131 = vector.extract_strided_slice %127 {offsets = [5, 0], sizes = [6, 4], strides = [1, 1]} : vector<16x4xf32> to vector<6x4xf32>
    %cst_143 = arith.constant dense<0xFF800000> : vector<4xf32>
    %132 = vector.multi_reduction <maximumf>, %131, %cst_143 [0] : vector<6x4xf32> to vector<4xf32>
    %133 = vector.shape_cast %132 : vector<4xf32> to vector<1x4xf32>
    %134 = vector.extract_strided_slice %127 {offsets = [11, 0], sizes = [5, 4], strides = [1, 1]} : vector<16x4xf32> to vector<5x4xf32>
    %cst_144 = arith.constant dense<0xFF800000> : vector<4xf32>
    %135 = vector.multi_reduction <maximumf>, %134, %cst_144 [0] : vector<5x4xf32> to vector<4xf32>
    %136 = vector.shape_cast %135 : vector<4xf32> to vector<1x4xf32>
    %c0_145 = arith.constant 0 : index
    %c5_146 = arith.constant 5 : index
    %c0_147 = arith.constant 0 : index
    %c0_148 = arith.constant 0 : index
    %137 = vector.load %arg1[%c0_145, %c5_146, %c0_147, %c0_148] : memref<1x16x16x4xf32, #tpu.memory_space<vmem>>, vector<1x1x16x4xf32>
    %138 = vector.shape_cast %137 : vector<1x1x16x4xf32> to vector<16x4xf32>
    %c0_149 = arith.constant 0 : index
    %c6_150 = arith.constant 6 : index
    %c0_151 = arith.constant 0 : index
    %c0_152 = arith.constant 0 : index
    %139 = vector.load %arg1[%c0_149, %c6_150, %c0_151, %c0_152] : memref<1x16x16x4xf32, #tpu.memory_space<vmem>>, vector<1x1x16x4xf32>
    %140 = vector.shape_cast %139 : vector<1x1x16x4xf32> to vector<16x4xf32>
    %141 = arith.maximumf %138, %140 : vector<16x4xf32>
    %c0_153 = arith.constant 0 : index
    %c7_154 = arith.constant 7 : index
    %c0_155 = arith.constant 0 : index
    %c0_156 = arith.constant 0 : index
    %142 = vector.load %arg1[%c0_153, %c7_154, %c0_155, %c0_156] : memref<1x16x16x4xf32, #tpu.memory_space<vmem>>, vector<1x1x16x4xf32>
    %143 = vector.shape_cast %142 : vector<1x1x16x4xf32> to vector<16x4xf32>
    %144 = arith.maximumf %141, %143 : vector<16x4xf32>
    %c0_157 = arith.constant 0 : index
    %c8_158 = arith.constant 8 : index
    %c0_159 = arith.constant 0 : index
    %c0_160 = arith.constant 0 : index
    %145 = vector.load %arg1[%c0_157, %c8_158, %c0_159, %c0_160] : memref<1x16x16x4xf32, #tpu.memory_space<vmem>>, vector<1x1x16x4xf32>
    %146 = vector.shape_cast %145 : vector<1x1x16x4xf32> to vector<16x4xf32>
    %147 = arith.maximumf %144, %146 : vector<16x4xf32>
    %c0_161 = arith.constant 0 : index
    %c9_162 = arith.constant 9 : index
    %c0_163 = arith.constant 0 : index
    %c0_164 = arith.constant 0 : index
    %148 = vector.load %arg1[%c0_161, %c9_162, %c0_163, %c0_164] : memref<1x16x16x4xf32, #tpu.memory_space<vmem>>, vector<1x1x16x4xf32>
    %149 = vector.shape_cast %148 : vector<1x1x16x4xf32> to vector<16x4xf32>
    %150 = arith.maximumf %147, %149 : vector<16x4xf32>
    %c0_165 = arith.constant 0 : index
    %c10_166 = arith.constant 10 : index
    %c0_167 = arith.constant 0 : index
    %c0_168 = arith.constant 0 : index
    %151 = vector.load %arg1[%c0_165, %c10_166, %c0_167, %c0_168] : memref<1x16x16x4xf32, #tpu.memory_space<vmem>>, vector<1x1x16x4xf32>
    %152 = vector.shape_cast %151 : vector<1x1x16x4xf32> to vector<16x4xf32>
    %153 = arith.maximumf %150, %152 : vector<16x4xf32>
    %154 = vector.extract_strided_slice %153 {offsets = [0, 0], sizes = [5, 4], strides = [1, 1]} : vector<16x4xf32> to vector<5x4xf32>
    %cst_169 = arith.constant dense<0xFF800000> : vector<4xf32>
    %155 = vector.multi_reduction <maximumf>, %154, %cst_169 [0] : vector<5x4xf32> to vector<4xf32>
    %156 = vector.shape_cast %155 : vector<4xf32> to vector<1x4xf32>
    %157 = vector.extract_strided_slice %153 {offsets = [5, 0], sizes = [6, 4], strides = [1, 1]} : vector<16x4xf32> to vector<6x4xf32>
    %cst_170 = arith.constant dense<0xFF800000> : vector<4xf32>
    %158 = vector.multi_reduction <maximumf>, %157, %cst_170 [0] : vector<6x4xf32> to vector<4xf32>
    %159 = vector.shape_cast %158 : vector<4xf32> to vector<1x4xf32>
    %160 = vector.extract_strided_slice %153 {offsets = [11, 0], sizes = [5, 4], strides = [1, 1]} : vector<16x4xf32> to vector<5x4xf32>
    %cst_171 = arith.constant dense<0xFF800000> : vector<4xf32>
    %161 = vector.multi_reduction <maximumf>, %160, %cst_171 [0] : vector<5x4xf32> to vector<4xf32>
    %162 = vector.shape_cast %161 : vector<4xf32> to vector<1x4xf32>
    %c0_172 = arith.constant 0 : index
    %c11_173 = arith.constant 11 : index
    %c0_174 = arith.constant 0 : index
    %c0_175 = arith.constant 0 : index
    %163 = vector.load %arg1[%c0_172, %c11_173, %c0_174, %c0_175] : memref<1x16x16x4xf32, #tpu.memory_space<vmem>>, vector<1x1x16x4xf32>
    %164 = vector.shape_cast %163 : vector<1x1x16x4xf32> to vector<16x4xf32>
    %c0_176 = arith.constant 0 : index
    %c12_177 = arith.constant 12 : index
    %c0_178 = arith.constant 0 : index
    %c0_179 = arith.constant 0 : index
    %165 = vector.load %arg1[%c0_176, %c12_177, %c0_178, %c0_179] : memref<1x16x16x4xf32, #tpu.memory_space<vmem>>, vector<1x1x16x4xf32>
    %166 = vector.shape_cast %165 : vector<1x1x16x4xf32> to vector<16x4xf32>
    %167 = arith.maximumf %164, %166 : vector<16x4xf32>
    %c0_180 = arith.constant 0 : index
    %c13_181 = arith.constant 13 : index
    %c0_182 = arith.constant 0 : index
    %c0_183 = arith.constant 0 : index
    %168 = vector.load %arg1[%c0_180, %c13_181, %c0_182, %c0_183] : memref<1x16x16x4xf32, #tpu.memory_space<vmem>>, vector<1x1x16x4xf32>
    %169 = vector.shape_cast %168 : vector<1x1x16x4xf32> to vector<16x4xf32>
    %170 = arith.maximumf %167, %169 : vector<16x4xf32>
    %c0_184 = arith.constant 0 : index
    %c14_185 = arith.constant 14 : index
    %c0_186 = arith.constant 0 : index
    %c0_187 = arith.constant 0 : index
    %171 = vector.load %arg1[%c0_184, %c14_185, %c0_186, %c0_187] : memref<1x16x16x4xf32, #tpu.memory_space<vmem>>, vector<1x1x16x4xf32>
    %172 = vector.shape_cast %171 : vector<1x1x16x4xf32> to vector<16x4xf32>
    %173 = arith.maximumf %170, %172 : vector<16x4xf32>
    %c0_188 = arith.constant 0 : index
    %c15_189 = arith.constant 15 : index
    %c0_190 = arith.constant 0 : index
    %c0_191 = arith.constant 0 : index
    %174 = vector.load %arg1[%c0_188, %c15_189, %c0_190, %c0_191] : memref<1x16x16x4xf32, #tpu.memory_space<vmem>>, vector<1x1x16x4xf32>
    %175 = vector.shape_cast %174 : vector<1x1x16x4xf32> to vector<16x4xf32>
    %176 = arith.maximumf %173, %175 : vector<16x4xf32>
    %177 = vector.extract_strided_slice %176 {offsets = [0, 0], sizes = [5, 4], strides = [1, 1]} : vector<16x4xf32> to vector<5x4xf32>
    %cst_192 = arith.constant dense<0xFF800000> : vector<4xf32>
    %178 = vector.multi_reduction <maximumf>, %177, %cst_192 [0] : vector<5x4xf32> to vector<4xf32>
    %179 = vector.shape_cast %178 : vector<4xf32> to vector<1x4xf32>
    %180 = vector.extract_strided_slice %176 {offsets = [5, 0], sizes = [6, 4], strides = [1, 1]} : vector<16x4xf32> to vector<6x4xf32>
    %cst_193 = arith.constant dense<0xFF800000> : vector<4xf32>
    %181 = vector.multi_reduction <maximumf>, %180, %cst_193 [0] : vector<6x4xf32> to vector<4xf32>
    %182 = vector.shape_cast %181 : vector<4xf32> to vector<1x4xf32>
    %183 = vector.extract_strided_slice %176 {offsets = [11, 0], sizes = [5, 4], strides = [1, 1]} : vector<16x4xf32> to vector<5x4xf32>
    %cst_194 = arith.constant dense<0xFF800000> : vector<4xf32>
    %184 = vector.multi_reduction <maximumf>, %183, %cst_194 [0] : vector<5x4xf32> to vector<4xf32>
    %185 = vector.shape_cast %184 : vector<4xf32> to vector<1x4xf32>
    %186 = tpu.concatenate %130, %133, %136, %156, %159, %162, %179, %182, %185 in 0 : vector<1x4xf32>, vector<1x4xf32>, vector<1x4xf32>, vector<1x4xf32>, vector<1x4xf32>, vector<1x4xf32>, vector<1x4xf32>, vector<1x4xf32>, vector<1x4xf32> -> vector<9x4xf32>
    %c0_195 = arith.constant 0 : index
    %c0_196 = arith.constant 0 : index
    %c0_197 = arith.constant 0 : index
    %187 = vector.load %arg4[%c0_195, %c0_196, %c0_197] : memref<1x9x4xf32, #tpu.memory_space<vmem>>, vector<1x9x4xf32>
    %188 = vector.shape_cast %187 : vector<1x9x4xf32> to vector<9x4xf32>
    %189 = vector.shape_cast %186 : vector<9x4xf32> to vector<1x9x4xf32>
    tpu.vector_store %arg4[%c0_195, %c0_196, %c0_197], %189 {strides = array<i32>} : memref<1x9x4xf32, #tpu.memory_space<vmem>>, vector<1x9x4xf32>,
    %c0_198 = arith.constant 0 : index
    %c0_199 = arith.constant 0 : index
    %c0_200 = arith.constant 0 : index
    %c0_201 = arith.constant 0 : index
    %190 = vector.load %arg1[%c0_198, %c0_199, %c0_200, %c0_201] : memref<1x16x16x4xf32, #tpu.memory_space<vmem>>, vector<1x1x16x4xf32>
    %191 = vector.shape_cast %190 : vector<1x1x16x4xf32> to vector<16x4xf32>
    %c0_202 = arith.constant 0 : index
    %c1_203 = arith.constant 1 : index
    %c0_204 = arith.constant 0 : index
    %c0_205 = arith.constant 0 : index
    %192 = vector.load %arg1[%c0_202, %c1_203, %c0_204, %c0_205] : memref<1x16x16x4xf32, #tpu.memory_space<vmem>>, vector<1x1x16x4xf32>
    %193 = vector.shape_cast %192 : vector<1x1x16x4xf32> to vector<16x4xf32>
    %194 = arith.maximumf %191, %193 : vector<16x4xf32>
    %c0_206 = arith.constant 0 : index
    %c2_207 = arith.constant 2 : index
    %c0_208 = arith.constant 0 : index
    %c0_209 = arith.constant 0 : index
    %195 = vector.load %arg1[%c0_206, %c2_207, %c0_208, %c0_209] : memref<1x16x16x4xf32, #tpu.memory_space<vmem>>, vector<1x1x16x4xf32>
    %196 = vector.shape_cast %195 : vector<1x1x16x4xf32> to vector<16x4xf32>
    %197 = arith.maximumf %194, %196 : vector<16x4xf32>
    %c0_210 = arith.constant 0 : index
    %c3_211 = arith.constant 3 : index
    %c0_212 = arith.constant 0 : index
    %c0_213 = arith.constant 0 : index
    %198 = vector.load %arg1[%c0_210, %c3_211, %c0_212, %c0_213] : memref<1x16x16x4xf32, #tpu.memory_space<vmem>>, vector<1x1x16x4xf32>
    %199 = vector.shape_cast %198 : vector<1x1x16x4xf32> to vector<16x4xf32>
    %200 = arith.maximumf %197, %199 : vector<16x4xf32>
    %201 = vector.extract_strided_slice %200 {offsets = [0, 0], sizes = [4, 4], strides = [1, 1]} : vector<16x4xf32> to vector<4x4xf32>
    %cst_214 = arith.constant dense<0xFF800000> : vector<4xf32>
    %202 = vector.multi_reduction <maximumf>, %201, %cst_214 [0] : vector<4x4xf32> to vector<4xf32>
    %203 = vector.shape_cast %202 : vector<4xf32> to vector<1x4xf32>
    %204 = vector.extract_strided_slice %200 {offsets = [4, 0], sizes = [4, 4], strides = [1, 1]} : vector<16x4xf32> to vector<4x4xf32>
    %cst_215 = arith.constant dense<0xFF800000> : vector<4xf32>
    %205 = vector.multi_reduction <maximumf>, %204, %cst_215 [0] : vector<4x4xf32> to vector<4xf32>
    %206 = vector.shape_cast %205 : vector<4xf32> to vector<1x4xf32>
    %207 = vector.extract_strided_slice %200 {offsets = [8, 0], sizes = [4, 4], strides = [1, 1]} : vector<16x4xf32> to vector<4x4xf32>
    %cst_216 = arith.constant dense<0xFF800000> : vector<4xf32>
    %208 = vector.multi_reduction <maximumf>, %207, %cst_216 [0] : vector<4x4xf32> to vector<4xf32>
    %209 = vector.shape_cast %208 : vector<4xf32> to vector<1x4xf32>
    %210 = vector.extract_strided_slice %200 {offsets = [12, 0], sizes = [4, 4], strides = [1, 1]} : vector<16x4xf32> to vector<4x4xf32>
    %cst_217 = arith.constant dense<0xFF800000> : vector<4xf32>
    %211 = vector.multi_reduction <maximumf>, %210, %cst_217 [0] : vector<4x4xf32> to vector<4xf32>
    %212 = vector.shape_cast %211 : vector<4xf32> to vector<1x4xf32>
    %c0_218 = arith.constant 0 : index
    %c4_219 = arith.constant 4 : index
    %c0_220 = arith.constant 0 : index
    %c0_221 = arith.constant 0 : index
    %213 = vector.load %arg1[%c0_218, %c4_219, %c0_220, %c0_221] : memref<1x16x16x4xf32, #tpu.memory_space<vmem>>, vector<1x1x16x4xf32>
    %214 = vector.shape_cast %213 : vector<1x1x16x4xf32> to vector<16x4xf32>
    %c0_222 = arith.constant 0 : index
    %c5_223 = arith.constant 5 : index
    %c0_224 = arith.constant 0 : index
    %c0_225 = arith.constant 0 : index
    %215 = vector.load %arg1[%c0_222, %c5_223, %c0_224, %c0_225] : memref<1x16x16x4xf32, #tpu.memory_space<vmem>>, vector<1x1x16x4xf32>
    %216 = vector.shape_cast %215 : vector<1x1x16x4xf32> to vector<16x4xf32>
    %217 = arith.maximumf %214, %216 : vector<16x4xf32>
    %c0_226 = arith.constant 0 : index
    %c6_227 = arith.constant 6 : index
    %c0_228 = arith.constant 0 : index
    %c0_229 = arith.constant 0 : index
    %218 = vector.load %arg1[%c0_226, %c6_227, %c0_228, %c0_229] : memref<1x16x16x4xf32, #tpu.memory_space<vmem>>, vector<1x1x16x4xf32>
    %219 = vector.shape_cast %218 : vector<1x1x16x4xf32> to vector<16x4xf32>
    %220 = arith.maximumf %217, %219 : vector<16x4xf32>
    %c0_230 = arith.constant 0 : index
    %c7_231 = arith.constant 7 : index
    %c0_232 = arith.constant 0 : index
    %c0_233 = arith.constant 0 : index
    %221 = vector.load %arg1[%c0_230, %c7_231, %c0_232, %c0_233] : memref<1x16x16x4xf32, #tpu.memory_space<vmem>>, vector<1x1x16x4xf32>
    %222 = vector.shape_cast %221 : vector<1x1x16x4xf32> to vector<16x4xf32>
    %223 = arith.maximumf %220, %222 : vector<16x4xf32>
    %224 = vector.extract_strided_slice %223 {offsets = [0, 0], sizes = [4, 4], strides = [1, 1]} : vector<16x4xf32> to vector<4x4xf32>
    %cst_234 = arith.constant dense<0xFF800000> : vector<4xf32>
    %225 = vector.multi_reduction <maximumf>, %224, %cst_234 [0] : vector<4x4xf32> to vector<4xf32>
    %226 = vector.shape_cast %225 : vector<4xf32> to vector<1x4xf32>
    %227 = vector.extract_strided_slice %223 {offsets = [4, 0], sizes = [4, 4], strides = [1, 1]} : vector<16x4xf32> to vector<4x4xf32>
    %cst_235 = arith.constant dense<0xFF800000> : vector<4xf32>
    %228 = vector.multi_reduction <maximumf>, %227, %cst_235 [0] : vector<4x4xf32> to vector<4xf32>
    %229 = vector.shape_cast %228 : vector<4xf32> to vector<1x4xf32>
    %230 = vector.extract_strided_slice %223 {offsets = [8, 0], sizes = [4, 4], strides = [1, 1]} : vector<16x4xf32> to vector<4x4xf32>
    %cst_236 = arith.constant dense<0xFF800000> : vector<4xf32>
    %231 = vector.multi_reduction <maximumf>, %230, %cst_236 [0] : vector<4x4xf32> to vector<4xf32>
    %232 = vector.shape_cast %231 : vector<4xf32> to vector<1x4xf32>
    %233 = vector.extract_strided_slice %223 {offsets = [12, 0], sizes = [4, 4], strides = [1, 1]} : vector<16x4xf32> to vector<4x4xf32>
    %cst_237 = arith.constant dense<0xFF800000> : vector<4xf32>
    %234 = vector.multi_reduction <maximumf>, %233, %cst_237 [0] : vector<4x4xf32> to vector<4xf32>
    %235 = vector.shape_cast %234 : vector<4xf32> to vector<1x4xf32>
    %c0_238 = arith.constant 0 : index
    %c8_239 = arith.constant 8 : index
    %c0_240 = arith.constant 0 : index
    %c0_241 = arith.constant 0 : index
    %236 = vector.load %arg1[%c0_238, %c8_239, %c0_240, %c0_241] : memref<1x16x16x4xf32, #tpu.memory_space<vmem>>, vector<1x1x16x4xf32>
    %237 = vector.shape_cast %236 : vector<1x1x16x4xf32> to vector<16x4xf32>
    %c0_242 = arith.constant 0 : index
    %c9_243 = arith.constant 9 : index
    %c0_244 = arith.constant 0 : index
    %c0_245 = arith.constant 0 : index
    %238 = vector.load %arg1[%c0_242, %c9_243, %c0_244, %c0_245] : memref<1x16x16x4xf32, #tpu.memory_space<vmem>>, vector<1x1x16x4xf32>
    %239 = vector.shape_cast %238 : vector<1x1x16x4xf32> to vector<16x4xf32>
    %240 = arith.maximumf %237, %239 : vector<16x4xf32>
    %c0_246 = arith.constant 0 : index
    %c10_247 = arith.constant 10 : index
    %c0_248 = arith.constant 0 : index
    %c0_249 = arith.constant 0 : index
    %241 = vector.load %arg1[%c0_246, %c10_247, %c0_248, %c0_249] : memref<1x16x16x4xf32, #tpu.memory_space<vmem>>, vector<1x1x16x4xf32>
    %242 = vector.shape_cast %241 : vector<1x1x16x4xf32> to vector<16x4xf32>
    %243 = arith.maximumf %240, %242 : vector<16x4xf32>
    %c0_250 = arith.constant 0 : index
    %c11_251 = arith.constant 11 : index
    %c0_252 = arith.constant 0 : index
    %c0_253 = arith.constant 0 : index
    %244 = vector.load %arg1[%c0_250, %c11_251, %c0_252, %c0_253] : memref<1x16x16x4xf32, #tpu.memory_space<vmem>>, vector<1x1x16x4xf32>
    %245 = vector.shape_cast %244 : vector<1x1x16x4xf32> to vector<16x4xf32>
    %246 = arith.maximumf %243, %245 : vector<16x4xf32>
    %247 = vector.extract_strided_slice %246 {offsets = [0, 0], sizes = [4, 4], strides = [1, 1]} : vector<16x4xf32> to vector<4x4xf32>
    %cst_254 = arith.constant dense<0xFF800000> : vector<4xf32>
    %248 = vector.multi_reduction <maximumf>, %247, %cst_254 [0] : vector<4x4xf32> to vector<4xf32>
    %249 = vector.shape_cast %248 : vector<4xf32> to vector<1x4xf32>
    %250 = vector.extract_strided_slice %246 {offsets = [4, 0], sizes = [4, 4], strides = [1, 1]} : vector<16x4xf32> to vector<4x4xf32>
    %cst_255 = arith.constant dense<0xFF800000> : vector<4xf32>
    %251 = vector.multi_reduction <maximumf>, %250, %cst_255 [0] : vector<4x4xf32> to vector<4xf32>
    %252 = vector.shape_cast %251 : vector<4xf32> to vector<1x4xf32>
    %253 = vector.extract_strided_slice %246 {offsets = [8, 0], sizes = [4, 4], strides = [1, 1]} : vector<16x4xf32> to vector<4x4xf32>
    %cst_256 = arith.constant dense<0xFF800000> : vector<4xf32>
    %254 = vector.multi_reduction <maximumf>, %253, %cst_256 [0] : vector<4x4xf32> to vector<4xf32>
    %255 = vector.shape_cast %254 : vector<4xf32> to vector<1x4xf32>
    %256 = vector.extract_strided_slice %246 {offsets = [12, 0], sizes = [4, 4], strides = [1, 1]} : vector<16x4xf32> to vector<4x4xf32>
    %cst_257 = arith.constant dense<0xFF800000> : vector<4xf32>
    %257 = vector.multi_reduction <maximumf>, %256, %cst_257 [0] : vector<4x4xf32> to vector<4xf32>
    %258 = vector.shape_cast %257 : vector<4xf32> to vector<1x4xf32>
    %c0_258 = arith.constant 0 : index
    %c12_259 = arith.constant 12 : index
    %c0_260 = arith.constant 0 : index
    %c0_261 = arith.constant 0 : index
    %259 = vector.load %arg1[%c0_258, %c12_259, %c0_260, %c0_261] : memref<1x16x16x4xf32, #tpu.memory_space<vmem>>, vector<1x1x16x4xf32>
    %260 = vector.shape_cast %259 : vector<1x1x16x4xf32> to vector<16x4xf32>
    %c0_262 = arith.constant 0 : index
    %c13_263 = arith.constant 13 : index
    %c0_264 = arith.constant 0 : index
    %c0_265 = arith.constant 0 : index
    %261 = vector.load %arg1[%c0_262, %c13_263, %c0_264, %c0_265] : memref<1x16x16x4xf32, #tpu.memory_space<vmem>>, vector<1x1x16x4xf32>
    %262 = vector.shape_cast %261 : vector<1x1x16x4xf32> to vector<16x4xf32>
    %263 = arith.maximumf %260, %262 : vector<16x4xf32>
    %c0_266 = arith.constant 0 : index
    %c14_267 = arith.constant 14 : index
    %c0_268 = arith.constant 0 : index
    %c0_269 = arith.constant 0 : index
    %264 = vector.load %arg1[%c0_266, %c14_267, %c0_268, %c0_269] : memref<1x16x16x4xf32, #tpu.memory_space<vmem>>, vector<1x1x16x4xf32>
    %265 = vector.shape_cast %264 : vector<1x1x16x4xf32> to vector<16x4xf32>
    %266 = arith.maximumf %263, %265 : vector<16x4xf32>
    %c0_270 = arith.constant 0 : index
    %c15_271 = arith.constant 15 : index
    %c0_272 = arith.constant 0 : index
    %c0_273 = arith.constant 0 : index
    %267 = vector.load %arg1[%c0_270, %c15_271, %c0_272, %c0_273] : memref<1x16x16x4xf32, #tpu.memory_space<vmem>>, vector<1x1x16x4xf32>
    %268 = vector.shape_cast %267 : vector<1x1x16x4xf32> to vector<16x4xf32>
    %269 = arith.maximumf %266, %268 : vector<16x4xf32>
    %270 = vector.extract_strided_slice %269 {offsets = [0, 0], sizes = [4, 4], strides = [1, 1]} : vector<16x4xf32> to vector<4x4xf32>
    %cst_274 = arith.constant dense<0xFF800000> : vector<4xf32>
    %271 = vector.multi_reduction <maximumf>, %270, %cst_274 [0] : vector<4x4xf32> to vector<4xf32>
    %272 = vector.shape_cast %271 : vector<4xf32> to vector<1x4xf32>
    %273 = vector.extract_strided_slice %269 {offsets = [4, 0], sizes = [4, 4], strides = [1, 1]} : vector<16x4xf32> to vector<4x4xf32>
    %cst_275 = arith.constant dense<0xFF800000> : vector<4xf32>
    %274 = vector.multi_reduction <maximumf>, %273, %cst_275 [0] : vector<4x4xf32> to vector<4xf32>
    %275 = vector.shape_cast %274 : vector<4xf32> to vector<1x4xf32>
    %276 = vector.extract_strided_slice %269 {offsets = [8, 0], sizes = [4, 4], strides = [1, 1]} : vector<16x4xf32> to vector<4x4xf32>
    %cst_276 = arith.constant dense<0xFF800000> : vector<4xf32>
    %277 = vector.multi_reduction <maximumf>, %276, %cst_276 [0] : vector<4x4xf32> to vector<4xf32>
    %278 = vector.shape_cast %277 : vector<4xf32> to vector<1x4xf32>
    %279 = vector.extract_strided_slice %269 {offsets = [12, 0], sizes = [4, 4], strides = [1, 1]} : vector<16x4xf32> to vector<4x4xf32>
    %cst_277 = arith.constant dense<0xFF800000> : vector<4xf32>
    %280 = vector.multi_reduction <maximumf>, %279, %cst_277 [0] : vector<4x4xf32> to vector<4xf32>
    %281 = vector.shape_cast %280 : vector<4xf32> to vector<1x4xf32>
    %282 = tpu.concatenate %203, %206, %209, %212, %226, %229, %232, %235, %249, %252, %255, %258, %272, %275, %278, %281 in 0 : vector<1x4xf32>, vector<1x4xf32>, vector<1x4xf32>, vector<1x4xf32>, vector<1x4xf32>, vector<1x4xf32>, vector<1x4xf32>, vector<1x4xf32>, vector<1x4xf32>, vector<1x4xf32>, vector<1x4xf32>, vector<1x4xf32>, vector<1x4xf32>, vector<1x4xf32>, vector<1x4xf32>, vector<1x4xf32> -> vector<16x4xf32>
    %c0_278 = arith.constant 0 : index
    %c0_279 = arith.constant 0 : index
    %c0_280 = arith.constant 0 : index
    %283 = vector.load %arg5[%c0_278, %c0_279, %c0_280] : memref<1x16x4xf32, #tpu.memory_space<vmem>>, vector<1x16x4xf32>
    %284 = vector.shape_cast %283 : vector<1x16x4xf32> to vector<16x4xf32>
    %285 = vector.shape_cast %282 : vector<16x4xf32> to vector<1x16x4xf32>
    tpu.vector_store %arg5[%c0_278, %c0_279, %c0_280], %285 {strides = array<i32>} : memref<1x16x4xf32, #tpu.memory_space<vmem>>, vector<1x16x4xf32>,
    return
  }
  func.func @transform_0(%arg0: i32) -> (i32, i32, i32, i32) {
    %c0_i32 = arith.constant 0 : i32
    %c0_i32_0 = arith.constant 0 : i32
    %c0_i32_1 = arith.constant 0 : i32
    %c0_i32_2 = arith.constant 0 : i32
    return %arg0, %c0_i32, %c0_i32_0, %c0_i32_1 : i32, i32, i32, i32
  }
  func.func @transform_1(%arg0: i32) -> (i32, i32, i32) {
    %c0_i32 = arith.constant 0 : i32
    %c0_i32_0 = arith.constant 0 : i32
    %c0_i32_1 = arith.constant 0 : i32
    return %arg0, %c0_i32, %c0_i32_0 : i32, i32, i32
  }
  func.func @transform_2(%arg0: i32) -> (i32, i32, i32) {
    %c0_i32 = arith.constant 0 : i32
    %c0_i32_0 = arith.constant 0 : i32
    %c0_i32_1 = arith.constant 0 : i32
    return %arg0, %c0_i32, %c0_i32_0 : i32, i32, i32
  }
  func.func @transform_3(%arg0: i32) -> (i32, i32, i32) {
    %c0_i32 = arith.constant 0 : i32
    %c0_i32_0 = arith.constant 0 : i32
    %c0_i32_1 = arith.constant 0 : i32
    return %arg0, %c0_i32, %c0_i32_0 : i32, i32, i32
  }
  func.func @transform_4(%arg0: i32) -> (i32, i32, i32) {
    %c0_i32 = arith.constant 0 : i32
    %c0_i32_0 = arith.constant 0 : i32
    %c0_i32_1 = arith.constant 0 : i32
    return %arg0, %c0_i32, %c0_i32_0 : i32, i32, i32
  }
}

</mosaic_0001>

<bundles_post_ra>
// kernel: tpu_custom_call.1
= control target key start
LH: loop header
LB: loop body
LE: loop exit
PB: predicated region body
PF: predicated region fallthrough
CT: control target
= control target key end

     0   :  { %10 = vsyncpa [#allocation3], 0  ;;  %s1632_s0 = inlined_call_operand.vmem [shape: f32[2,16,16,4], index: 0, kind: input, shape index: {}]   ;;  %s1633_s1 = inlined_call_operand.hbm [shape: f32[2,1,4], index: 1, kind: output, shape index: {0}]   ;;  %s1634_s2 = inlined_call_operand.hbm [shape: f32[2,4,4], index: 2, kind: output, shape index: {1}]   ;;  %s1635_s3 = inlined_call_operand.vmem [shape: f32[2,9,4], index: 3, kind: output, shape index: {2}]   ;;  %s1636_s4 = inlined_call_operand.vmem [shape: f32[2,16,4], index: 4, kind: output, shape index: {3}]  }
   0x1   :  { %12 = vsyncpa [#allocation3 + $0x1], 0 }
   0x2   :  { %13 = vsyncpa [#allocation5], 0 }
   0x3   :  { %15 = vsyncpa [#allocation5 + $0x1], 0  ;;  %s1233_s15 = smov 0   ;;  %s1235_s16 = smov 0  }
   0x4   :  { %s1237_s17 = smov 0   ;;  %s1239_s18 = smov 0  }
   0x5 LB: > { %s1254_s19 = sadd.s32 4294967295, %s1206_s18   ;;  %s930_s20 = sadd.s32 4294967294, %s1206_s18   ;;  %s1206_s18 = sphi %s1239_s18, %s1642_s18   ;;  %s1202_s17 = sphi %s1237_s17, %s1641_s17   ;;  %s1198_s16 = sphi %s1235_s16, %s1640_s16   ;;  %s1194_s15 = sphi %s1233_s15, %s1639_s15  }
   0x6   : > { %s1258_s21 = sadd.s32 1, %s1206_s18   ;;  %s54_s22 = sadd.s32 1, %s1202_s17 }
   0x7   : > { %s51_s23 = ssub.s32 %s1206_s18, %s1258_s21  ;;  %p64_p0 = scmp.ne.s32.totalorder %s1202_s17, %s1198_s16 }
   0x8   : > { %p52_p1 = scmp.eq.s32.totalorder %s51_s23, 0  ;;  %p65_p2 = scmp.eq.s32.totalorder %s1254_s19, 1 }
   0x9   : > { %p70_p3 = scmp.ne.s32.totalorder %s1198_s16, %s1194_s15  ;;  %p71_p4 = scmp.eq.s32.totalorder %s930_s20, 1 }
   0xa   : > { %s1269_s24 = scalar_select %p52_p1, %s1202_s17, %s54_s22  }
   0xb   : > { %p1271_p5 = por %p65_p2, %p64_p0  ;;  %p1275_p6 = por %p71_p4, %p70_p3 }
   0xc   : > { %p933_p7 = scmp.ge.s32.totalorder %s1206_s18, 1  ;;  %p175_p8 = scmp.lt.s32.totalorder %s1206_s18, 3 }
   0xe   : > { %p176_p9 = pnand %p933_p7, %p175_p8 }
   0xf   : > { %p215_p10 = scmp.lt.s32.totalorder (!%p176_p9), %s1254_s19, 1  ;;  %s1439_s6 = sand.u32 (!%p176_p9), 1, %s1198_s16  }
  0x10   : > { %179 = sbr.rel (%p176_p9) target bundleno = 123 (0x7b), region = 24  ;;  %s934_s7 = sshll.u32 (!%p176_p9), %s1439_s6, 2 }
  0x11   : > { %s1062_s8 = sshll.u32 (!%p176_p9), %s1254_s19, 2  ;;  %s200_s12 = scalar_lea.vmem (!%p176_p9), [#allocation4], %s934_s7 }
  0x12   : > { %s1457_s11 = scalar_lea.hbm (!%p176_p9), %s1634_s2, %s1062_s8  ;;  %s784_s13 = sshll.u32 (!%p176_p9), %s200_s12, 4  ;;  %s1482_s13 = int_to_ptr.vmem [resolvable:$true] %s784_s13 }
  0x13   : > { %s786_s14 = sshll.u32 (!%p176_p9), %s1457_s11, 4  ;;  %s749_s20 = scalar_lea.sflag (!%p176_p9), [#allocation5], %s1439_s6  ;;  %s787_s14 = int_to_ptr.hbm [resolvable:$true] %s786_s14 }
  0x14   : > { %s1126_s22 = sshra.s32 (!%p176_p9), %s787_s14, 4  ;;  %s1132_s30 = scalar_lea.hbm (!%p176_p9), %s1634_s2, 8  ;;  %s1127_s22 = int_to_ptr.hbm [resolvable:$true] %s1126_s22 }
  0x15   : > { %s1283_s27 = scalar_select %p215_p10, %s1254_s19, 1  ;;  %vm441_vm0 = vcmask 31749   ;;  %vm443_vm1 = vcmask 26624   ;;  %vm433_vm2 = vcmask 28672   ;;  %vm307_vm3 = vcmask 31744  }
  0x16   : > { %vm413_vm4 = vcmask 27648   ;;  %vm452_vm5 = vcmask 31747   ;;  %vm407_vm6 = vcmask 1040384   ;;  %vm409_vm7 = vcmask 1041408   ;;  %s1128_s23 = scalar_lea.hbm %s1127_s22, 4  ;;  %p1133_p0 = scmp.lt.s32.totalorder %s1127_s22, %s1634_s2 }
  0x17   : > { %s1065_s28 = sshll.u32 %s1283_s27, 8  ;;  %vm411_vm8 = vcmask 1042432   ;;  %p1129_p11 = scmp.ne.s32.totalorder %s1127_s22, %s1128_s23 }
  0x18   : > { %s1289_s5 = scalar_lea.vmem %s1632_s0, %s1065_s28  ;;  %p1134_p1 = scmp.lt.s32.totalorder %s1132_s30, %s1128_s23 }
  0x19   : > { %v230_v0 = vld [vmem:[%s1289_s5] sm:$0xff]  ;;  %v231_v1 = vld [vmem:[%s1289_s5 + $0x8] sm:$0xff]  ;;  %v941_v2 = vld [vmem:[%s1289_s5 + $0x10] sm:$0xff]  ;;  %p1130_p12 = pnand %p1129_p11, %p1271_p5 }
  0x1a   : > { %v942_v3 = vld [vmem:[%s1289_s5 + $0x18] sm:$0xff]  ;;  %v235_v4 = vmax.f32 %v230_v0, %v941_v2  ;;  %v943_v5 = vld [vmem:[%s1289_s5 + $0x20] sm:$0xff]  ;;  %v944_v6 = vld [vmem:[%s1289_s5 + $0x28] sm:$0xff]  ;;  %p1135_p2 = por %p1134_p1, %p1133_p0 }
  0x1b   : > { %v236_v7 = vmax.f32 %v231_v1, %v942_v3  ;;  %v945_v8 = vld [vmem:[%s1289_s5 + $0x30] sm:$0xff]  ;;  %v946_v10 = vld [vmem:[%s1289_s5 + $0x38] sm:$0xff]  ;;  %v1300_v11 = vld [vmem:[%s1289_s5 + $0x40] sm:$0xff]  ;;  %p1131_p13 = pneg %p1130_p12 }
  0x1c   : > { %v240_v9 = vmax.f32 %v235_v4, %v943_v5  ;;  %v1303_v12 = vld [vmem:[%s1289_s5 + $0x48] sm:$0xff]  ;;  %v1306_v14 = vld [vmem:[%s1289_s5 + $0x50] sm:$0xff]  ;;  %v1309_v15 = vld [vmem:[%s1289_s5 + $0x58] sm:$0xff] }
  0x1d   : > { %v241_v13 = vmax.f32 %v236_v7, %v944_v6  ;;  %v1312_v16 = vld [vmem:[%s1289_s5 + $0x60] sm:$0xff]  ;;  %v1317_v18 = vld [vmem:[%s1289_s5 + $0x68] sm:$0xff]  ;;  %v1330_v23 = vld [vmem:[%s1289_s5 + $0x90] sm:$0xff]  ;;  %p1136_p3 = pnand %p1135_p2, %p1131_p13 }
  0x1e   : > { %v1314_v17 = vmax.f32 %v240_v9, %v945_v8  ;;  %v1320_v19 = vld [vmem:[%s1289_s5 + $0x80] sm:$0xff]  ;;  %v1323_v20 = vld [vmem:[%s1289_s5 + $0x88] sm:$0xff]  ;;  %v464_v21 = vmax.f32 %v1306_v14, %v1312_v16  ;;  %v1333_v24 = vld [vmem:[%s1289_s5 + $0x98] sm:$0xff]  ;;  %v465_v26 = vmax.f32 %v1309_v15, %v1317_v18 }
  0x1f   : > { %v1327_v22 = vmax.f32 %v241_v13, %v946_v10  ;;  %v1336_v25 = vld [vmem:[%s1289_s5 + $0xa0] sm:$0xff]  ;;  %v1343_v28 = vld [vmem:[%s1289_s5 + $0xa8] sm:$0xff]  ;;  %v367_v29 = vmax.f32 %v1320_v19, %v1330_v23  ;;  %v368_v30 = vmax.f32 %v1323_v20, %v1333_v24  ;;  %v1352_v32 = vld [vmem:[%s1289_s5 + $0x70] sm:$0xff] }
  0x20   : > { %v250_v27 = vmax.f32 %v1314_v17, %v1300_v11  ;;  %v1355_v33 = vld [vmem:[%s1289_s5 + $0xb0] sm:$0xff]  ;;  %v1358_v34 = vld [vmem:[%s1289_s5 + $0xb8] sm:$0xff]  ;;  %v1367_v39 = vmax.f32 %v464_v21, %v1352_v32  ;;  %v1371_v41 = vld [vmem:[%s1289_s5 + $0xc0] sm:$0xff]  ;;  %v1399_v55 = vsel %vm413_vm4, %v1314_v17, -inf }
  0x21   : > { %v251_v31 = vmax.f32 %v1327_v22, %v1303_v12  ;;  %v1362_v36 = vld [vmem:[%s1289_s5 + $0x78] sm:$0xff]  ;;  %v371_v37 = vmax.f32 %v367_v29, %v1336_v25  ;;  %v372_v38 = vmax.f32 %v368_v30, %v1343_v28  ;;  %v1374_v42 = vld [vmem:[%s1289_s5 + $0xc8] sm:$0xff]  ;;  %v1390_v51 = vld [vmem:[%s1289_s5 + $0xd0] sm:$0xff] }
  0x22   : > { %v255_v35 = vmax.f32 %v250_v27, %v1306_v14  ;;  %v434_v43 = vsel %vm433_vm2, %v250_v27, -inf  ;;  %v442_v44 = vsel %vm441_vm0, %v250_v27, -inf  ;;  %v1379_v45 = vmax.f32 %v465_v26, %v1362_v36  ;;  %v1393_v52 = vld [vmem:[%s1289_s5 + $0xd8] sm:$0xff]  ;;  %v1410_v61 = vld [vmem:[%s1289_s5 + $0xe0] sm:$0xff]  ;;  %v1413_v62 = vld [vmem:[%s1289_s5 + $0xe8] sm:$0xff] }
  0x23   : > { %v256_v40 = vmax.f32 %v251_v31, %v1309_v15  ;;  %v1383_v47 = vmax.f32 %v371_v37, %v1355_v33  ;;  %v1386_v48 = vmax.f32 %v372_v38, %v1358_v34  ;;  %v435_v49 = vrot.slane %v434_v43, 4  ;;  %v1421_v7 = vld [vmem:[%s1289_s5 + $0xf0] sm:$0xff]  ;;  %v1424_v8 = vld [vmem:[%s1289_s5 + $0xf8] sm:$0xff] }
  0x24   : > { %v260_v46 = vmax.f32 %v255_v35, %v1312_v16  ;;  %v444_v53 = vsel %vm443_vm1, %v251_v31, -inf  ;;  %v453_v54 = vsel %vm452_vm5, %v251_v31, -inf  ;;  %v472_v59 = vmax.f32 %v1367_v39, %v1320_v19 }
  0x25   : > { %v261_v50 = vmax.f32 %v256_v40, %v1317_v18  ;;  %v379_v57 = vmax.f32 %v1383_v47, %v1371_v41  ;;  %v380_v58 = vmax.f32 %v1386_v48, %v1374_v42  ;;  %v436_v63 = vmax.f32 %v434_v43, %v435_v49 }
  0x26   : > { %v265_v56 = vmax.f32 %v260_v46, %v1352_v32  ;;  %v445_v0 = vmax.f32 %v442_v44, %v444_v53  ;;  %v454_v1 = vrot.slane %v453_v54, 4 }
  0x27   : > { %v266_v60 = vmax.f32 %v261_v50, %v1362_v36  ;;  %v383_v4 = vmax.f32 %v379_v57, %v1390_v51  ;;  %v384_v5 = vmax.f32 %v380_v58, %v1393_v52  ;;  %v437_v13 = vrot.slane %v436_v63, 2 }
  0x28   : > { %v270_v2 = vmax.f32 %v265_v56, %v1320_v19  ;;  %v349_v3 = vsel %vm307_vm3, %v265_v56, -inf  ;;  %v446_v37 = vrot.slane %v445_v0, 4 }
  0x29   : > { %v271_v6 = vmax.f32 %v266_v60, %v1323_v20  ;;  %v350_v9 = vrot.slane %v349_v3, 4  ;;  %v356_v10 = vsel %vm307_vm3, %v266_v60, -inf  ;;  %v387_v27 = vmax.f32 %v383_v4, %v1410_v61 }
  0x2a   : > { %v275_v21 = vmax.f32 %v270_v2, %v1330_v23  ;;  %v357_v26 = vrot.slane %v356_v10, 4  ;;  %v388_v29 = vmax.f32 %v384_v5, %v1413_v62  ;;  %v438_v35 = vmax.f32 %v436_v63, %v437_v13 }
  0x2b   : > { %v276_v30 = vmax.f32 %v271_v6, %v1333_v24  ;;  %v351_v31 = vmax.f32 %v349_v3, %v350_v9  ;;  %v391_v43 = vmax.f32 %v387_v27, %v1421_v7  ;;  %v447_v53 = vmax.f32 %v445_v0, %v446_v37 }
  0x2c   : > { %v280_v38 = vmax.f32 %v275_v21, %v1336_v25  ;;  %v358_v40 = vmax.f32 %v356_v10, %v357_v26  ;;  %v392_v44 = vmax.f32 %v388_v29, %v1424_v8  ;;  %v439_v50 = vrot.slane %v438_v35, 1 }
  0x2d   : > { %v281_v46 = vmax.f32 %v276_v30, %v1343_v28  ;;  %v352_v49 = vrot.slane %v351_v31, 2  ;;  %v393_v58 = vsel %vm307_vm3, %v391_v43, -inf  ;;  %v448_v9 = vrot.slane %v447_v53, 2 }
  0x2e   : > { %v285_v56 = vmax.f32 %v280_v38, %v1355_v33  ;;  %v359_v57 = vrot.slane %v358_v40, 2  ;;  %v400_v60 = vsel %vm307_vm3, %v392_v44, -inf  ;;  %v394_v3 = vrot.slane %v393_v58, 4 }
  0x2f   : > { %v286_v63 = vmax.f32 %v281_v46, %v1358_v34  ;;  %v353_v2 = vmax.f32 %v351_v31, %v352_v49  ;;  %v401_v4 = vrot.slane %v400_v60, 4  ;;  %v1443_v0 = vmax.f32 %v438_v35, %v439_v50 }
  0x30   : > { %v290_v5 = vmax.f32 %v285_v56, %v1371_v41  ;;  %v360_v6 = vmax.f32 %v358_v40, %v359_v57  ;;  %v395_v21 = vmax.f32 %v393_v58, %v394_v3  ;;  %v449_v30 = vmax.f32 %v447_v53, %v448_v9 }
  0x31   : > { %v291_v10 = vmax.f32 %v286_v63, %v1374_v42  ;;  %v354_v13 = vrot.slane %v353_v2, 1  ;;  %v402_v26 = vmax.f32 %v400_v60, %v401_v4  ;;  %v455_v31 = vmax.f32 %v453_v54, %v454_v1 }
  0x32   : > { %v295_v27 = vmax.f32 %v290_v5, %v1390_v51  ;;  %v361_v29 = vrot.slane %v360_v6, 1  ;;  %v396_v40 = vrot.slane %v395_v21, 2  ;;  %v450_v46 = vrot.slane %v449_v30, 1 }
  0x33   : > { %v296_v37 = vmax.f32 %v291_v10, %v1393_v52  ;;  %v355_v38 = vmax.f32 %v353_v2, %v354_v13  ;;  %v403_v35 = vrot.slane %v402_v26, 2  ;;  %v456_v49 = vrot.slane %v455_v31, 2 }
  0x34   : > { %v300_v43 = vmax.f32 %v295_v27, %v1410_v61  ;;  %v362_v44 = vmax.f32 %v360_v6, %v361_v29  ;;  %v397_v56 = vmax.f32 %v395_v21, %v396_v40  ;;  %v473_v54 = vmax.f32 %v1379_v45, %v1323_v20 }
  0x35   : > { %v301_v50 = vmax.f32 %v296_v37, %v1413_v62  ;;  %v404_v57 = vmax.f32 %v402_v26, %v403_v35  ;;  %v451_v58 = vmax.f32 %v449_v30, %v450_v46  ;;  %v457_v60 = vmax.f32 %v455_v31, %v456_v49 }
  0x36   : > { %v305_v1 = vmax.f32 %v300_v43, %v1421_v7  ;;  %v408_v53 = vsel %vm407_vm6, %v355_v38, %v362_v44  ;;  %v398_v2 = vrot.slane %v397_v56, 1  ;;  %v476_v20 = vmax.f32 %v472_v59, %v1330_v23 }
  0x37   : > { %v306_v63 = vmax.f32 %v301_v50, %v1424_v8  ;;  %v405_v3 = vrot.slane %v404_v57, 1  ;;  %v458_v4 = vrot.slane %v457_v60, 1  ;;  %v477_v5 = vmax.f32 %v473_v54, %v1333_v24 }
  0x38   : > { %v308_v45 = vsel %vm307_vm3, %v305_v1, -inf  ;;  %v509_v6 = vmax.f32 %v1355_v33, %v1371_v41  ;;  %v399_v10 = vmax.f32 %v397_v56, %v398_v2  ;;  %v480_v21 = vmax.f32 %v476_v20, %v1336_v25 }
  0x39   : > { %v309_v9 = vsel %vm307_vm3, %v306_v63, -inf  ;;  %v406_v13 = vmax.f32 %v404_v57, %v405_v3  ;;  %v459_v23 = vmax.f32 %v457_v60, %v458_v4  ;;  %v481_v39 = vmax.f32 %v477_v5, %v1343_v28 }
  0x3a   : > { %v310_v19 = vmax.f32 %v308_v45, %v309_v9  ;;  %v510_v24 = vmax.f32 %v1358_v34, %v1374_v42  ;;  %v410_v59 = vsel %vm409_vm7, %v408_v53, %v399_v10  ;;  %v482_v33 = vsel %vm433_vm2, %v480_v21, -inf }
  0x3b   : > { %v489_v26 = vsel %vm441_vm0, %v480_v21, -inf  ;;  %v513_v27 = vmax.f32 %v509_v6, %v1390_v51  ;;  %v412_v29 = vsel %vm411_vm8, %v410_v59, %v406_v13  ;;  %v483_v30 = vrot.slane %v482_v33, 4 }
  0x3c   : > { %v311_v25 = vrot.slane %v310_v19, 4  ;;  %v490_v28 = vsel %vm443_vm1, %v481_v39, -inf  ;;  %414 = vst.msk [vmem:[%s200_s12] sm:$0xf] %vm413_vm4, %v412_v29  ;;  %v498_v31 = vsel %vm452_vm5, %v481_v39, -inf  ;;  %v514_v37 = vmax.f32 %v510_v24, %v1393_v52 }
  0x3d   : > { %v491_v34 = vmax.f32 %v489_v26, %v490_v28  ;;  %v517_v38 = vmax.f32 %v513_v27, %v1410_v61  ;;  %v484_v35 = vmax.f32 %v482_v33, %v483_v30  ;;  %v499_v43 = vrot.slane %v498_v31, 4 }
  0x3e   : > { %v312_v40 = vmax.f32 %v310_v19, %v311_v25  ;;  %v546_v44 = vsel %vm407_vm6, %v1443_v0, %v451_v58 }
  0x3f   : > { %1139 = shalt.err (!%p1136_p3)
}
  0x40   : > { %1069 = dma.vmem_to_hbm [thread:$0]  (%p1271_p5), %s1482_s13, 64, %s787_s14, %s749_s20   ;;  %vm317_vm9 = vcmask 24576   ;;  %v492_v0 = vrot.slane %v491_v34, 4  ;;  %v518_v46 = vmax.f32 %v514_v37, %v1413_v62  ;;  %v521_v49 = vmax.f32 %v517_v38, %v1421_v7 }
  0x41   : > { %v313_v50 = vrot.slane %v312_v40, 2  ;;  %v485_v56 = vrot.slane %v484_v35, 2  ;;  %v500_v57 = vmax.f32 %v498_v31, %v499_v43  ;;  %v547_v54 = vsel %vm409_vm7, %v546_v44, %v459_v23  ;;  %s768_s10 = scalar_lea.hbm %s1633_s1, %s1254_s19  ;;  %s193_s11 = scalar_lea.vmem [#allocation2], %s1439_s6 }
  0x42   : > { %v493_v1 = vmax.f32 %v491_v34, %v492_v0  ;;  %v522_v53 = vmax.f32 %v518_v46, %v1424_v8  ;;  %v523_v58 = vsel %vm433_vm2, %v521_v49, -inf  ;;  %v530_v60 = vsel %vm441_vm0, %v521_v49, -inf  ;;  %s1517_s12 = sshll.u32 %s193_s11, 4  ;;  %s1519_s19 = sshll.u32 %s768_s10, 4  ;;  %s771_s12 = int_to_ptr.vmem [resolvable:$true] %s1517_s12  ;;  %s773_s19 = int_to_ptr.hbm [resolvable:$true] %s1519_s19 }
  0x43   : > { %v314_v63 = vmax.f32 %v312_v40, %v313_v50  ;;  %v486_v2 = vmax.f32 %v484_v35, %v485_v56  ;;  %v501_v3 = vrot.slane %v500_v57, 2  ;;  %v524_v20 = vrot.slane %v523_v58, 4  ;;  %s745_s13 = scalar_lea.sflag [#allocation3], %s1439_s6  ;;  %s1154_s14 = sshra.s32 %s773_s19, 4  ;;  %s1155_s14 = int_to_ptr.hbm [resolvable:$true] %s1154_s14 }
  0x44   : > { %v494_v45 = vrot.slane %v493_v1, 2  ;;  %v531_v4 = vsel %vm443_vm1, %v522_v53, -inf  ;;  %v539_v5 = vsel %vm452_vm5, %v522_v53, -inf  ;;  %vm549_vm10 = vcmask 1043456   ;;  %s1156_s20 = scalar_lea.hbm %s1155_s14, 1  ;;  %s1160_s28 = scalar_lea.hbm %s1633_s1, 2 }
  0x45   : > { %v315_v6 = vrot.slane %v314_v63, 1  ;;  %v487_v9 = vrot.slane %v486_v2, 1  ;;  %v502_v10 = vmax.f32 %v500_v57, %v501_v3  ;;  %v525_v13 = vmax.f32 %v523_v58, %v524_v20  ;;  %p1157_p4 = scmp.ne.s32.totalorder %s1155_s14, %s1156_s20  ;;  %p1161_p9 = scmp.lt.s32.totalorder %s1155_s14, %s1633_s1 }
  0x46   : > { %v495_v21 = vmax.f32 %v493_v1, %v494_v45  ;;  %v532_v19 = vmax.f32 %v530_v60, %v531_v4  ;;  %v540_v23 = vrot.slane %v539_v5, 4  ;;  %vm551_vm11 = vcmask 1044480   ;;  %p1162_p10 = scmp.lt.s32.totalorder %s1160_s28, %s1156_s20 }
  0x47   : > { %v316_v39 = vmax.f32 %v314_v63, %v315_v6  ;;  %v488_v24 = vmax.f32 %v486_v2, %v487_v9  ;;  %v503_v59 = vrot.slane %v502_v10, 1  ;;  %v526_v33 = vrot.slane %v525_v13, 2  ;;  %p1158_p7 = pnand %p1157_p4, %p1271_p5 }
  0x48   : > { %v496_v26 = vrot.slane %v495_v21, 1  ;;  %v533_v27 = vrot.slane %v532_v19, 4  ;;  %v541_v25 = vmax.f32 %v539_v5, %v540_v23  ;;  %vm553_vm12 = vcmask 1045504   ;;  %p1163_p11 = por %p1162_p10, %p1161_p9 }
  0x49   : > { %318 = vst.msk [vmem:[%s193_s11] sm:$0x1] %vm317_vm9, %v316_v39  ;;  %v504_v29 = vmax.f32 %v502_v10, %v503_v59  ;;  %v527_v30 = vmax.f32 %v525_v13, %v526_v33  ;;  %v548_v28 = vsel %vm411_vm8, %v547_v54, %v488_v24  ;;  %v574_v34 = vrot.slane %v1399_v55, 4  ;;  %p1159_p8 = pneg %p1158_p7 }
  0x4a   : > { %v497_v31 = vmax.f32 %v495_v21, %v496_v26  ;;  %v534_v37 = vmax.f32 %v532_v19, %v533_v27  ;;  %v542_v38 = vrot.slane %v541_v25, 2  ;;  %vm580_vm13 = vcmask 31748  }
  0x4b   : > { %p1164_p12 = pnand %p1163_p11, %p1159_p8 }
  0x4d   : > { %1167 = shalt.err (!%p1164_p12)
}
  0x4e   : > { %1068 = dma.vmem_to_hbm [thread:$0]  (%p1271_p5), %s771_s12, 16, %s773_s19, %s745_s13   ;;  %v528_v40 = vrot.slane %v527_v30, 1  ;;  %v575_v35 = vmax.f32 %v1399_v55, %v574_v34  ;;  %v581_v43 = vsel %vm580_vm13, %v1314_v17, -inf  ;;  %v588_v44 = vsel %vm413_vm4, %v1327_v22, -inf }
  0x4f   : > { %s1066_s6 = sshll.u32 %s1283_s27, 4  ;;  %v535_v0 = vrot.slane %v534_v37, 2  ;;  %v543_v46 = vmax.f32 %v541_v25, %v542_v38  ;;  %v550_v49 = vsel %vm549_vm10, %v548_v28, %v497_v31  ;;  %v582_v50 = vrot.slane %v581_v43, 4 }
  0x50   : > { %v529_v56 = vmax.f32 %v527_v30, %v528_v40  ;;  %v552_v57 = vsel %vm551_vm11, %v550_v49, %v504_v29  ;;  %v576_v54 = vrot.slane %v575_v35, 2  ;;  %v589_v1 = vrot.slane %v588_v44, 4  ;;  %s224_s7 = scalar_lea.vmem %s1635_s3, %s1066_s6  ;;  %s1598_s10 = scalar_lea.vmem %s1636_s4, %s1066_s6 }
  0x51   : > { %v536_v53 = vmax.f32 %v534_v37, %v535_v0  ;;  %v544_v55 = vrot.slane %v543_v46, 1  ;;  %v583_v58 = vmax.f32 %v581_v43, %v582_v50  ;;  %v595_v17 = vsel %vm580_vm13, %v1327_v22, -inf }
  0x52   : > { %vm555_vm14 = vcmask 1046528   ;;  %v577_v60 = vmax.f32 %v575_v35, %v576_v54  ;;  %v590_v63 = vmax.f32 %v588_v44, %v589_v1  ;;  %v596_v2 = vrot.slane %v595_v17, 4 }
  0x53   : > { %v537_v3 = vrot.slane %v536_v53, 1  ;;  %v545_v20 = vmax.f32 %v543_v46, %v544_v55  ;;  %v584_v45 = vrot.slane %v583_v58, 2  ;;  %v606_v4 = vmax.f32 %v1300_v11, %v1306_v14 }
  0x54   : > { %v554_v5 = vsel %vm553_vm12, %v552_v57, %v529_v56  ;;  %v591_v6 = vrot.slane %v590_v63, 2  ;;  %v597_v9 = vmax.f32 %v595_v17, %v596_v2  ;;  %v607_v22 = vmax.f32 %v1303_v12, %v1309_v15 }
  0x55   : > { %v538_v10 = vmax.f32 %v536_v53, %v537_v3  ;;  %558 = vst.msk [vmem:[%s224_s7 + $0x8] sm:$0x1] %vm317_vm9, %v545_v20  ;;  %v610_v13 = vmax.f32 %v606_v4, %v1312_v16  ;;  %v658_v21 = vsel %vm413_vm4, %v1383_v47, -inf  ;;  %v578_v19 = vrot.slane %v577_v60, 1 }
  0x56   : > { %v585_v23 = vmax.f32 %v583_v58, %v584_v45  ;;  %v598_v39 = vrot.slane %v597_v9, 2  ;;  %v611_v11 = vmax.f32 %v607_v22, %v1317_v18  ;;  %v659_v59 = vrot.slane %v658_v21, 4 }
  0x57   : > { %v556_v14 = vsel %vm555_vm14, %v554_v5, %v538_v10  ;;  %v614_v24 = vmax.f32 %v610_v13, %v1352_v32  ;;  %v592_v12 = vmax.f32 %v590_v63, %v591_v6  ;;  %v665_v16 = vsel %vm580_vm13, %v1383_v47, -inf }
  0x58   : > { %557 = vst.msk [vmem:[%s224_s7] sm:$0xff] %vm307_vm3, %v556_v14  ;;  %v615_v15 = vmax.f32 %v611_v11, %v1362_v36  ;;  %v599_v33 = vmax.f32 %v597_v9, %v598_v39  ;;  %v660_v25 = vmax.f32 %v658_v21, %v659_v59  ;;  %v579_v18 = vmax.f32 %v577_v60, %v578_v19 }
  0x59   : > { %v616_v26 = vsel %vm413_vm4, %v614_v24, -inf  ;;  %v623_v27 = vsel %vm580_vm13, %v614_v24, -inf  ;;  %v586_v29 = vrot.slane %v585_v23, 1  ;;  %v666_v37 = vrot.slane %v665_v16, 4 }
  0x5a   : > { %v617_v30 = vrot.slane %v616_v26, 4  ;;  %v624_v28 = vrot.slane %v623_v27, 4  ;;  %v630_v32 = vsel %vm413_vm4, %v615_v15, -inf  ;;  %v637_v34 = vsel %vm580_vm13, %v615_v15, -inf }
  0x5b   : > { %v661_v31 = vrot.slane %v660_v25, 2  ;;  %v593_v36 = vrot.slane %v592_v12, 1  ;;  %v631_v47 = vrot.slane %v630_v32, 4  ;;  %v600_v35 = vrot.slane %v599_v33, 1 }
  0x5c   : > { %v618_v38 = vmax.f32 %v616_v26, %v617_v30  ;;  %v625_v40 = vmax.f32 %v623_v27, %v624_v28  ;;  %v638_v43 = vrot.slane %v637_v34, 4  ;;  %v667_v44 = vmax.f32 %v665_v16, %v666_v37 }
  0x5d   : > { %v672_v0 = vsel %vm413_vm4, %v1386_v48, -inf  ;;  %v632_v50 = vmax.f32 %v630_v32, %v631_v47  ;;  %v662_v54 = vmax.f32 %v660_v25, %v661_v31  ;;  %v679_v53 = vsel %vm580_vm13, %v1386_v48, -inf }
  0x5e   : > { %v619_v46 = vrot.slane %v618_v38, 2  ;;  %v626_v49 = vrot.slane %v625_v40, 2  ;;  %v673_v56 = vrot.slane %v672_v0, 4  ;;  %v639_v57 = vmax.f32 %v637_v34, %v638_v43 }
  0x5f   : > { %v668_v1 = vrot.slane %v667_v44, 2  ;;  %v633_v17 = vrot.slane %v632_v50, 2  ;;  %v587_v63 = vmax.f32 %v585_v23, %v586_v29  ;;  %v680_v20 = vrot.slane %v679_v53, 4 }
  0x60   : > { %v620_v55 = vmax.f32 %v618_v38, %v619_v46  ;;  %v627_v58 = vmax.f32 %v625_v40, %v626_v49  ;;  %v674_v60 = vmax.f32 %v672_v0, %v673_v56  ;;  %v640_v2 = vrot.slane %v639_v57, 2 }
  0x61   : > { %v669_v3 = vmax.f32 %v667_v44, %v668_v1  ;;  %v634_v5 = vmax.f32 %v632_v50, %v633_v17  ;;  %v594_v9 = vmax.f32 %v592_v12, %v593_v36  ;;  %v681_v10 = vmax.f32 %v679_v53, %v680_v20 }
  0x62   : > { %v621_v45 = vrot.slane %v620_v55, 1  ;;  %v628_v4 = vrot.slane %v627_v58, 1  ;;  %v675_v6 = vrot.slane %v674_v60, 2  ;;  %v641_v22 = vmax.f32 %v639_v57, %v640_v2 }
  0x63   : > { %v690_v13 = vmax.f32 %v1371_v41, %v1390_v51  ;;  %v601_v21 = vmax.f32 %v599_v33, %v600_v35  ;;  %v635_v48 = vrot.slane %v634_v5, 1  ;;  %v663_v19 = vrot.slane %v662_v54, 1 }
  0x64   : > { %v676_v39 = vmax.f32 %v674_v60, %v675_v6  ;;  %v622_v11 = vmax.f32 %v620_v55, %v621_v45  ;;  %v642_v14 = vrot.slane %v641_v22, 1  ;;  %v682_v23 = vrot.slane %v681_v10, 2 }
  0x65   : > { %v691_v24 = vmax.f32 %v1374_v42, %v1393_v52  ;;  %v629_v59 = vmax.f32 %v627_v58, %v628_v4  ;;  %v670_v15 = vrot.slane %v669_v3, 1  ;;  %v694_v16 = vmax.f32 %v690_v13, %v1410_v61 }
  0x66   : > { %v728_v12 = vsel %vm407_vm6, %v579_v18, %v587_v63  ;;  %v677_v26 = vrot.slane %v676_v39, 1  ;;  %v636_v33 = vmax.f32 %v634_v5, %v635_v48  ;;  %v683_v27 = vmax.f32 %v681_v10, %v682_v23 }
  0x67   : > { %v695_v41 = vmax.f32 %v691_v24, %v1413_v62  ;;  %v729_v51 = vsel %vm409_vm7, %v728_v12, %v594_v9  ;;  %v698_v25 = vmax.f32 %v694_v16, %v1421_v7  ;;  %v643_v30 = vmax.f32 %v641_v22, %v642_v14 }
  0x68   : > { %v730_v29 = vsel %vm411_vm8, %v729_v51, %v601_v21  ;;  %v664_v42 = vmax.f32 %v662_v54, %v663_v19  ;;  %v671_v28 = vmax.f32 %v669_v3, %v670_v15  ;;  %v678_v7 = vmax.f32 %v676_v39, %v677_v26 }
  0x69   : > { %v699_v52 = vmax.f32 %v695_v41, %v1424_v8  ;;  %v731_v61 = vsel %vm549_vm10, %v730_v29, %v622_v11  ;;  %v700_v18 = vsel %vm413_vm4, %v698_v25, -inf  ;;  %v707_v32 = vsel %vm580_vm13, %v698_v25, -inf }
  0x6a   : > { %v732_v62 = vsel %vm551_vm11, %v731_v61, %v629_v59  ;;  %v701_v34 = vrot.slane %v700_v18, 4  ;;  %v708_v31 = vrot.slane %v707_v32, 4  ;;  %v684_v37 = vrot.slane %v683_v27, 1 }
  0x6b   : > { %v714_v8 = vsel %vm413_vm4, %v699_v52, -inf  ;;  %v721_v38 = vsel %vm580_vm13, %v699_v52, -inf  ;;  %v733_v40 = vsel %vm553_vm12, %v732_v62, %v636_v33  ;;  %v735_v46 = vsel %vm407_vm6, %v664_v42, %v671_v28 }
  0x6c   : > { %v715_v36 = vrot.slane %v714_v8, 4  ;;  %v702_v47 = vmax.f32 %v700_v18, %v701_v34  ;;  %v709_v35 = vmax.f32 %v707_v32, %v708_v31  ;;  %v722_v43 = vrot.slane %v721_v38, 4 }
  0x6d   : > { %v734_v44 = vsel %vm555_vm14, %v733_v40, %v643_v30  ;;  %v685_v57 = vmax.f32 %v683_v27, %v684_v37  ;;  %v736_v58 = vsel %vm409_vm7, %v735_v46, %v678_v7 }
  0x6e   : > { %v716_v0 = vmax.f32 %v714_v8, %v715_v36  ;;  %742 = vst.msk [vmem:[%s1598_s10] sm:$0xff] %vm307_vm3, %v734_v44  ;;  %v703_v49 = vrot.slane %v702_v47, 2  ;;  %v710_v50 = vrot.slane %v709_v35, 2  ;;  %v723_v56 = vmax.f32 %v721_v38, %v722_v43 }
  0x6f   : > { %v737_v20 = vsel %vm411_vm8, %v736_v58, %v685_v57 }
  0x70   : > { %v717_v54 = vrot.slane %v716_v0, 2  ;;  %v704_v1 = vmax.f32 %v702_v47, %v703_v49  ;;  %v711_v53 = vmax.f32 %v709_v35, %v710_v50  ;;  %v724_v55 = vrot.slane %v723_v56, 2 }
  0x72   : > { %v718_v17 = vmax.f32 %v716_v0, %v717_v54  ;;  %v705_v60 = vrot.slane %v704_v1, 1  ;;  %v712_v63 = vrot.slane %v711_v53, 1  ;;  %v725_v2 = vmax.f32 %v723_v56, %v724_v55 }
  0x74   : > { %v719_v3 = vrot.slane %v718_v17, 1  ;;  %v706_v45 = vmax.f32 %v704_v1, %v705_v60  ;;  %v713_v4 = vmax.f32 %v711_v53, %v712_v63  ;;  %v726_v5 = vrot.slane %v725_v2, 1 }
  0x76   : > { %v720_v6 = vmax.f32 %v718_v17, %v719_v3  ;;  %v727_v9 = vmax.f32 %v725_v2, %v726_v5  ;;  %v738_v22 = vsel %vm549_vm10, %v737_v20, %v706_v45 }
  0x77   : > { %v739_v10 = vsel %vm551_vm11, %v738_v22, %v713_v4 }
  0x78   : > { %v740_v13 = vsel %vm553_vm12, %v739_v10, %v720_v6 }
  0x79   : > { %v741_v21 = vsel %vm555_vm14, %v740_v13, %v727_v9 }
  0x7a   : > { %743 = vst.msk [vmem:[%s1598_s10 + $0x8] sm:$0xff] %vm307_vm3, %v741_v21 }
  0x7b PF: > { %p1079_p5 = scmp.ge.s32.totalorder %s1206_s18, 2  ;;  %s804_s27 = sand.u32 1, %s1194_s15  }
  0x7c   : > { %s805_s11 = scalar_lea.sflag [#allocation3], %s804_s27 }
  0x7d   : > { %p1073_p13 = pnand %p1079_p5, %p1275_p6 }
  0x7f   : > { %p1074_p0 = pneg %p1073_p13 }
  0x81   : > { %1185 = dma.done.wait (%p1074_p0), %s805_s11, 16  }
  0x82   : > { %1187 = vsyncadd (%p1074_p0), %s805_s11, 4294967280  ;;  %s814_s12 = scalar_lea.sflag [#allocation5], %s804_s27 }
  0x83   : > { %1189 = dma.done.wait (%p1074_p0), %s814_s12, 64  }
  0x84   : > { %1191 = vsyncadd (%p1074_p0), %s814_s12, 4294967232  ;;  %p18_p1 = scmp.ge.s32.totalorder %s1258_s21, 4   ;;  %s1639_s15 = smov %s1198_s16 }
  0x85   : > { %s1640_s16 = smov %s1202_s17  ;;  %s1641_s17 = smov %s1269_s24 }
  0x86   : > { %s1642_s18 = smov %s1258_s21  ;;  %20 = sbr.rel (!%p18_p1) target bundleno = 5 (0x5), region = 115 }
  0x8b   :  { %836 = vsyncpa [#allocation3], 1 }
  0x8c   :  { %838 = vsyncpa [#allocation3 + $0x1], 1 }
  0x8d   :  { %839 = vsyncpa [#allocation5], 1 }
  0x8e   :  { %841 = vsyncpa [#allocation5 + $0x1], 1 }

</bundles_post_ra>
